<compile_context>
chip_gen: v6e
topology: v6e:2x2x1
jax: 0.10.0
libtpu: 0.0.40
codegen_flags: <defaults>
</compile_context>

<pallas_src>
import math
import jax
import jax.numpy as jnp
from jax.experimental import pallas as pl
from jax.experimental.pallas import tpu as pltpu

# Small synthetic LUKE config
B, S, H = 2, 8, 32          # batch, max_length (seq), hidden
NUM_HEADS = 4
HEAD_DIM = H // NUM_HEADS
INTERMEDIATE = 64
NUM_LAYERS = 2
VOCAB = 50
MAX_POS = 16
LN_EPS = 1e-12
T = B * S                   # flattened token count handled in one kernel step


def _layer_norm(x, g, b):
    mu = jnp.mean(x, axis=-1, keepdims=True)
    var = jnp.mean((x - mu) ** 2, axis=-1, keepdims=True)
    return (x - mu) * jax.lax.rsqrt(var + LN_EPS) * g + b


def _gelu(x):
    # TODO(synk): LUKE/BERT use erf-GELU; tanh approximation kept for clean EUP lowering.
    return 0.5 * x * (1.0 + jnp.tanh(0.7978845608028654 * (x + 0.044715 * x * x * x)))


def luke_encoder_kernel(
    x_ref, mask_ref,
    emb_g_ref, emb_b_ref,
    wqkv_ref, bqkv_ref, wo_ref, bo_ref,
    ln1_g_ref, ln1_b_ref,
    w1_ref, b1_ref, w2_ref, b2_ref,
    ln2_g_ref, ln2_b_ref,
    out_ref,
):
    """Single invocation: embeddings-LN + NUM_LAYERS transformer layers over all T tokens."""
    bf = jnp.bfloat16
    x = x_ref[...]                    # (T, H) f32 summed embeddings
    add_mask = mask_ref[...]          # (T, T) additive mask (padding + block-diagonal batch)

    # embedding LayerNorm (dropout is identity in eval mode)
    x = _layer_norm(x, emb_g_ref[...], emb_b_ref[...])

    for l in range(NUM_LAYERS):
        # ---- multi-head self-attention ----
        x_bf = x.astype(bf)                                            # hoisted cast, reused below
        # fused QKV: one lane-dense (T,H)@(H,3H) bf16 matmul, f32 accumulation + bias, one cast.
        # 1/sqrt(HEAD_DIM) is already folded into the q columns / bias (wrapper).
        qkv = (jnp.dot(x_bf, wqkv_ref[l], preferred_element_type=jnp.float32)
               + bqkv_ref[l]).astype(bf)                               # (T, 3H) bf16

        ctx_parts = []
        for h in range(NUM_HEADS):                                     # per-head (T,T) core only
            qh = qkv[:, h * HEAD_DIM:(h + 1) * HEAD_DIM]               # (T, HD) bf16
            kh = qkv[:, H + h * HEAD_DIM:H + (h + 1) * HEAD_DIM]
            vh = qkv[:, 2 * H + h * HEAD_DIM:2 * H + (h + 1) * HEAD_DIM]
            # transpose folded into the contraction (no explicit kh.T)
            s = jnp.einsum('qd,kd->qk', qh, kh,
                           preferred_element_type=jnp.float32) + add_mask   # (T, T) f32
            s = s - jnp.max(s, axis=-1, keepdims=True)
            p = jnp.exp(s)
            p = p * pl.reciprocal(jnp.sum(p, axis=-1, keepdims=True), approx=True)
            ctx_parts.append(jnp.dot(p.astype(bf), vh,
                                     preferred_element_type=jnp.float32))   # (T, HD) f32

        # lane-concat heads -> (T, H); one K=H output projection against un-split Wo
        ctx = jnp.concatenate(ctx_parts, axis=-1)                       # (T, H) f32
        attn_out = jnp.dot(ctx.astype(bf), wo_ref[l],
                           preferred_element_type=jnp.float32) + bo_ref[l]  # (T, H)
        x = _layer_norm(x + attn_out, ln1_g_ref[l], ln1_b_ref[l])

        # ---- feed-forward (f32 VPU math, bf16 MXU operands) ----
        hmid = _gelu(jnp.dot(x.astype(bf), w1_ref[l],
                             preferred_element_type=jnp.float32) + b1_ref[l])
        ffn_out = jnp.dot(hmid.astype(bf), w2_ref[l],
                          preferred_element_type=jnp.float32) + b2_ref[l]
        x = _layer_norm(x + ffn_out, ln2_g_ref[l], ln2_b_ref[l])

    out_ref[...] = x


def init_params(key):
    def nrm(k, shape):
        return 0.02 * jax.random.normal(k, shape, jnp.float32)

    ks = jax.random.split(key, 16)
    p = {
        "word_emb": nrm(ks[0], (VOCAB, H)),
        "pos_emb":  nrm(ks[1], (MAX_POS, H)),
        "type_emb": nrm(ks[2], (2, H)),
        "emb_g": jnp.ones((1, H), jnp.float32),
        "emb_b": jnp.zeros((1, H), jnp.float32),
        "wq": nrm(ks[3], (NUM_LAYERS, H, H)), "bq": jnp.zeros((NUM_LAYERS, 1, H), jnp.float32),
        "wk": nrm(ks[4], (NUM_LAYERS, H, H)), "bk": jnp.zeros((NUM_LAYERS, 1, H), jnp.float32),
        "wv": nrm(ks[5], (NUM_LAYERS, H, H)), "bv": jnp.zeros((NUM_LAYERS, 1, H), jnp.float32),
        "wo": nrm(ks[6], (NUM_LAYERS, H, H)), "bo": jnp.zeros((NUM_LAYERS, 1, H), jnp.float32),
        "ln1_g": jnp.ones((NUM_LAYERS, 1, H), jnp.float32),
        "ln1_b": jnp.zeros((NUM_LAYERS, 1, H), jnp.float32),
        "w1": nrm(ks[7], (NUM_LAYERS, H, INTERMEDIATE)),
        "b1": jnp.zeros((NUM_LAYERS, 1, INTERMEDIATE), jnp.float32),
        "w2": nrm(ks[8], (NUM_LAYERS, INTERMEDIATE, H)),
        "b2": jnp.zeros((NUM_LAYERS, 1, H), jnp.float32),
        "ln2_g": jnp.ones((NUM_LAYERS, 1, H), jnp.float32),
        "ln2_b": jnp.zeros((NUM_LAYERS, 1, H), jnp.float32),
    }
    return p


def luke_base_layer_forward(words, mask, params):
    """words: (B, S) int32, mask: (B, S) {0,1}. Returns (B, S, H) word sequence output."""
    bf = jnp.bfloat16
    scale = 1.0 / math.sqrt(HEAD_DIM)

    # Embedding gather + sum stays in glue; LayerNorm + encoder run in the kernel.
    # word_segment_ids = zeros -> token_type embedding row 0.
    # TODO(synk): RoBERTa-style position-id offset (padding_idx+1) not replicated.
    emb = (jnp.take(params["word_emb"], words, axis=0)
           + params["pos_emb"][None, :S, :]
           + params["type_emb"][0][None, None, :])
    x = emb.reshape(T, H).astype(jnp.float32)

    # additive mask: -1e4 for padded keys and for cross-batch (block-diagonal) pairs,
    # so a single flattened-token kernel step reproduces per-batch attention.
    key_valid = mask.astype(jnp.float32).reshape(1, T)                       # (1, T)
    batch_ids = jnp.repeat(jnp.arange(B, dtype=jnp.int32), S)                # (T,)
    same_batch = (batch_ids[:, None] == batch_ids[None, :]).astype(jnp.float32)
    add_mask = (1.0 - same_batch * key_valid) * -10000.0                     # (T, T)

    # Host-side (free) weight prep:
    #  * fold the attention scale into Wq/bq,
    #  * fuse Q/K/V into a single (H, 3H) head-major operand, biases into (1, 3H),
    #  * bf16 MXU operands; biases / LN params stay f32 and lane-dense (last dim H / 3H).
    wqkv = jnp.concatenate(
        [params["wq"] * scale, params["wk"], params["wv"]], axis=-1).astype(bf)   # (L, H, 3H)
    bqkv = jnp.concatenate(
        [params["bq"] * scale, params["bk"], params["bv"]], axis=-1)              # (L, 1, 3H)
    wo = params["wo"].astype(bf)                                                  # (L, H, H)
    w1 = params["w1"].astype(bf)
    w2 = params["w2"].astype(bf)

    args = [
        x, add_mask,
        params["emb_g"], params["emb_b"],
        wqkv, bqkv, wo, params["bo"],
        params["ln1_g"], params["ln1_b"],
        w1, params["b1"], w2, params["b2"],
        params["ln2_g"], params["ln2_b"],
    ]

    vmem_spec = pl.BlockSpec(memory_space=pltpu.MemorySpace.VMEM)
    # Single invocation (no grid): all activations and weights fit VMEM at toy size,
    # so there is no pipelining overhead and no double-buffered weight copies.
    out = pl.pallas_call(
        luke_encoder_kernel,
        out_shape=jax.ShapeDtypeStruct((T, H), jnp.float32),
        in_specs=[vmem_spec] * len(args),
        out_specs=vmem_spec,
        compiler_params=pltpu.CompilerParams(vmem_limit_bytes=64 * 1024 * 1024),
    )(*args)
    return out.reshape(B, S, H)


if __name__ == "__main__":
    key = jax.random.PRNGKey(0)
    pkey, wkey = jax.random.split(key)
    params = init_params(pkey)

    words = jax.random.randint(wkey, (B, S), 0, VOCAB, dtype=jnp.int32)
    # attention mask: first sequence full, second padded after 5 tokens
    mask = jnp.array([[1] * S, [1] * 5 + [0] * (S - 5)], dtype=jnp.int32)

    out = jax.jit(luke_base_layer_forward)(words, mask, params)
    jax.block_until_ready(out)
    assert out.shape == (B, S, H) and out.dtype == jnp.float32
    print("KERNEL_OK")
</pallas_src>

<mosaic_0001>
module attributes {stable_mosaic.version = 11 : i64} {
  func.func @luke_encoder_kernel(%arg0: memref<16x32xf32, #tpu.memory_space<vmem>>, %arg1: memref<16x16xf32, #tpu.memory_space<vmem>>, %arg2: memref<1x32xf32, #tpu.memory_space<vmem>>, %arg3: memref<1x32xf32, #tpu.memory_space<vmem>>, %arg4: memref<2x32x96xbf16, #tpu.memory_space<vmem>>, %arg5: memref<2x1x96xf32, #tpu.memory_space<vmem>>, %arg6: memref<2x32x32xbf16, #tpu.memory_space<vmem>>, %arg7: memref<2x1x32xf32, #tpu.memory_space<vmem>>, %arg8: memref<2x1x32xf32, #tpu.memory_space<vmem>>, %arg9: memref<2x1x32xf32, #tpu.memory_space<vmem>>, %arg10: memref<2x32x64xbf16, #tpu.memory_space<vmem>>, %arg11: memref<2x1x64xf32, #tpu.memory_space<vmem>>, %arg12: memref<2x64x32xbf16, #tpu.memory_space<vmem>>, %arg13: memref<2x1x32xf32, #tpu.memory_space<vmem>>, %arg14: memref<2x1x32xf32, #tpu.memory_space<vmem>>, %arg15: memref<2x1x32xf32, #tpu.memory_space<vmem>>, %arg16: memref<16x32xf32, #tpu.memory_space<vmem>>) attributes {dimension_semantics = [], scalar_prefetch = 0 : i64, scratch_operands = 0 : i64, tpu.core_type = #tpu.core_type<tc>} {
    %c0 = arith.constant 0 : index
    %c0_0 = arith.constant 0 : index
    %0 = vector.load %arg0[%c0, %c0_0] : memref<16x32xf32, #tpu.memory_space<vmem>>, vector<16x32xf32>
    %c0_1 = arith.constant 0 : index
    %c0_2 = arith.constant 0 : index
    %1 = vector.load %arg1[%c0_1, %c0_2] : memref<16x16xf32, #tpu.memory_space<vmem>>, vector<16x16xf32>
    %c0_3 = arith.constant 0 : index
    %c0_4 = arith.constant 0 : index
    %2 = vector.load %arg2[%c0_3, %c0_4] : memref<1x32xf32, #tpu.memory_space<vmem>>, vector<1x32xf32>
    %c0_5 = arith.constant 0 : index
    %c0_6 = arith.constant 0 : index
    %3 = vector.load %arg3[%c0_5, %c0_6] : memref<1x32xf32, #tpu.memory_space<vmem>>, vector<1x32xf32>
    %cst = arith.constant dense<0.000000e+00> : vector<16xf32>
    %4 = vector.multi_reduction <add>, %0, %cst [1] : vector<16x32xf32> to vector<16xf32>
    %5 = vector.shape_cast %4 : vector<16xf32> to vector<16x1xf32>
    %cst_7 = arith.constant 3.200000e+01 : f32
    %6 = vector.broadcast %cst_7 : f32 to vector<16x1xf32>
    %7 = arith.divf %5, %6 : vector<16x1xf32>
    %8 = vector.broadcast %7 : vector<16x1xf32> to vector<16x32xf32>
    %9 = arith.subf %0, %8 : vector<16x32xf32>
    %10 = arith.mulf %9, %9 : vector<16x32xf32>
    %cst_8 = arith.constant dense<0.000000e+00> : vector<16xf32>
    %11 = vector.multi_reduction <add>, %10, %cst_8 [1] : vector<16x32xf32> to vector<16xf32>
    %12 = vector.shape_cast %11 : vector<16xf32> to vector<16x1xf32>
    %cst_9 = arith.constant 3.200000e+01 : f32
    %13 = vector.broadcast %cst_9 : f32 to vector<16x1xf32>
    %14 = arith.divf %12, %13 : vector<16x1xf32>
    %15 = vector.broadcast %7 : vector<16x1xf32> to vector<16x32xf32>
    %16 = arith.subf %0, %15 : vector<16x32xf32>
    %cst_10 = arith.constant 9.99999996E-13 : f32
    %17 = vector.broadcast %cst_10 : f32 to vector<16x1xf32>
    %18 = arith.addf %14, %17 : vector<16x1xf32>
    %19 = math.rsqrt %18 : vector<16x1xf32>
    %20 = vector.broadcast %19 : vector<16x1xf32> to vector<16x32xf32>
    %21 = arith.mulf %16, %20 : vector<16x32xf32>
    %22 = vector.broadcast %2 : vector<1x32xf32> to vector<16x32xf32>
    %23 = arith.mulf %21, %22 : vector<16x32xf32>
    %24 = vector.broadcast %3 : vector<1x32xf32> to vector<16x32xf32>
    %25 = arith.addf %23, %24 : vector<16x32xf32>
    %26 = arith.truncf %25 : vector<16x32xf32> to vector<16x32xbf16>
    %c0_11 = arith.constant 0 : index
    %c0_12 = arith.constant 0 : index
    %c0_13 = arith.constant 0 : index
    %27 = vector.load %arg4[%c0_11, %c0_12, %c0_13] : memref<2x32x96xbf16, #tpu.memory_space<vmem>>, vector<1x32x96xbf16>
    %28 = vector.shape_cast %27 : vector<1x32x96xbf16> to vector<32x96xbf16>
    %cst_14 = arith.constant dense<0.000000e+00> : vector<16x96xf32>
    %29 = tpu.matmul %26, %28, %cst_14 {dimension_numbers = #tpu.dot_dimension_numbers<[1], [0], [0], [1], [0, 0, 1, 1], [], []>} : vector<16x32xbf16>, vector<32x96xbf16>, vector<16x96xf32> -> vector<16x96xf32>
    %c0_15 = arith.constant 0 : index
    %c0_16 = arith.constant 0 : index
    %c0_17 = arith.constant 0 : index
    %30 = vector.load %arg5[%c0_15, %c0_16, %c0_17] : memref<2x1x96xf32, #tpu.memory_space<vmem>>, vector<1x1x96xf32>
    %31 = vector.shape_cast %30 : vector<1x1x96xf32> to vector<1x96xf32>
    %32 = vector.broadcast %31 : vector<1x96xf32> to vector<16x96xf32>
    %33 = arith.addf %29, %32 : vector<16x96xf32>
    %34 = arith.truncf %33 : vector<16x96xf32> to vector<16x96xbf16>
    %35 = vector.extract_strided_slice %34 {offsets = [0, 0], sizes = [16, 8], strides = [1, 1]} : vector<16x96xbf16> to vector<16x8xbf16>
    %36 = vector.extract_strided_slice %34 {offsets = [0, 32], sizes = [16, 8], strides = [1, 1]} : vector<16x96xbf16> to vector<16x8xbf16>
    %37 = vector.extract_strided_slice %34 {offsets = [0, 64], sizes = [16, 8], strides = [1, 1]} : vector<16x96xbf16> to vector<16x8xbf16>
    "tpu.trace_start"() <{level = 10 : i32, message = "qd,kd->qk"}> : () -> ()
    %cst_18 = arith.constant dense<0.000000e+00> : vector<16x16xf32>
    %38 = tpu.matmul %35, %36, %cst_18 {dimension_numbers = #tpu.dot_dimension_numbers<[1], [1], [0], [0], [0, 0, 1, 0], [], []>} : vector<16x8xbf16>, vector<16x8xbf16>, vector<16x16xf32> -> vector<16x16xf32>
    "tpu.trace_stop"() : () -> ()
    %39 = arith.addf %38, %1 : vector<16x16xf32>
    %cst_19 = arith.constant dense<0xFF800000> : vector<16xf32>
    %40 = vector.multi_reduction <maximumf>, %39, %cst_19 [1] : vector<16x16xf32> to vector<16xf32>
    %41 = vector.shape_cast %40 : vector<16xf32> to vector<16x1xf32>
    %42 = vector.broadcast %41 : vector<16x1xf32> to vector<16x16xf32>
    %43 = arith.subf %39, %42 : vector<16x16xf32>
    %44 = math.exp %43 : vector<16x16xf32>
    %cst_20 = arith.constant dense<0.000000e+00> : vector<16xf32>
    %45 = vector.multi_reduction <add>, %44, %cst_20 [1] : vector<16x16xf32> to vector<16xf32>
    %46 = vector.shape_cast %45 : vector<16xf32> to vector<16x1xf32>
    %47 = tpu.reciprocal %46 {approx = true} : vector<16x1xf32> -> vector<16x1xf32>
    %48 = vector.broadcast %47 : vector<16x1xf32> to vector<16x16xf32>
    %49 = arith.mulf %44, %48 : vector<16x16xf32>
    %50 = arith.truncf %49 : vector<16x16xf32> to vector<16x16xbf16>
    %cst_21 = arith.constant dense<0.000000e+00> : vector<16x8xf32>
    %51 = tpu.matmul %50, %37, %cst_21 {dimension_numbers = #tpu.dot_dimension_numbers<[1], [0], [0], [1], [0, 0, 1, 1], [], []>} : vector<16x16xbf16>, vector<16x8xbf16>, vector<16x8xf32> -> vector<16x8xf32>
    %52 = vector.extract_strided_slice %34 {offsets = [0, 8], sizes = [16, 8], strides = [1, 1]} : vector<16x96xbf16> to vector<16x8xbf16>
    %53 = vector.extract_strided_slice %34 {offsets = [0, 40], sizes = [16, 8], strides = [1, 1]} : vector<16x96xbf16> to vector<16x8xbf16>
    %54 = vector.extract_strided_slice %34 {offsets = [0, 72], sizes = [16, 8], strides = [1, 1]} : vector<16x96xbf16> to vector<16x8xbf16>
    "tpu.trace_start"() <{level = 10 : i32, message = "qd,kd->qk"}> : () -> ()
    %cst_22 = arith.constant dense<0.000000e+00> : vector<16x16xf32>
    %55 = tpu.matmul %52, %53, %cst_22 {dimension_numbers = #tpu.dot_dimension_numbers<[1], [1], [0], [0], [0, 0, 1, 0], [], []>} : vector<16x8xbf16>, vector<16x8xbf16>, vector<16x16xf32> -> vector<16x16xf32>
    "tpu.trace_stop"() : () -> ()
    %56 = arith.addf %55, %1 : vector<16x16xf32>
    %cst_23 = arith.constant dense<0xFF800000> : vector<16xf32>
    %57 = vector.multi_reduction <maximumf>, %56, %cst_23 [1] : vector<16x16xf32> to vector<16xf32>
    %58 = vector.shape_cast %57 : vector<16xf32> to vector<16x1xf32>
    %59 = vector.broadcast %58 : vector<16x1xf32> to vector<16x16xf32>
    %60 = arith.subf %56, %59 : vector<16x16xf32>
    %61 = math.exp %60 : vector<16x16xf32>
    %cst_24 = arith.constant dense<0.000000e+00> : vector<16xf32>
    %62 = vector.multi_reduction <add>, %61, %cst_24 [1] : vector<16x16xf32> to vector<16xf32>
    %63 = vector.shape_cast %62 : vector<16xf32> to vector<16x1xf32>
    %64 = tpu.reciprocal %63 {approx = true} : vector<16x1xf32> -> vector<16x1xf32>
    %65 = vector.broadcast %64 : vector<16x1xf32> to vector<16x16xf32>
    %66 = arith.mulf %61, %65 : vector<16x16xf32>
    %67 = arith.truncf %66 : vector<16x16xf32> to vector<16x16xbf16>
    %cst_25 = arith.constant dense<0.000000e+00> : vector<16x8xf32>
    %68 = tpu.matmul %67, %54, %cst_25 {dimension_numbers = #tpu.dot_dimension_numbers<[1], [0], [0], [1], [0, 0, 1, 1], [], []>} : vector<16x16xbf16>, vector<16x8xbf16>, vector<16x8xf32> -> vector<16x8xf32>
    %69 = vector.extract_strided_slice %34 {offsets = [0, 16], sizes = [16, 8], strides = [1, 1]} : vector<16x96xbf16> to vector<16x8xbf16>
    %70 = vector.extract_strided_slice %34 {offsets = [0, 48], sizes = [16, 8], strides = [1, 1]} : vector<16x96xbf16> to vector<16x8xbf16>
    %71 = vector.extract_strided_slice %34 {offsets = [0, 80], sizes = [16, 8], strides = [1, 1]} : vector<16x96xbf16> to vector<16x8xbf16>
    "tpu.trace_start"() <{level = 10 : i32, message = "qd,kd->qk"}> : () -> ()
    %cst_26 = arith.constant dense<0.000000e+00> : vector<16x16xf32>
    %72 = tpu.matmul %69, %70, %cst_26 {dimension_numbers = #tpu.dot_dimension_numbers<[1], [1], [0], [0], [0, 0, 1, 0], [], []>} : vector<16x8xbf16>, vector<16x8xbf16>, vector<16x16xf32> -> vector<16x16xf32>
    "tpu.trace_stop"() : () -> ()
    %73 = arith.addf %72, %1 : vector<16x16xf32>
    %cst_27 = arith.constant dense<0xFF800000> : vector<16xf32>
    %74 = vector.multi_reduction <maximumf>, %73, %cst_27 [1] : vector<16x16xf32> to vector<16xf32>
    %75 = vector.shape_cast %74 : vector<16xf32> to vector<16x1xf32>
    %76 = vector.broadcast %75 : vector<16x1xf32> to vector<16x16xf32>
    %77 = arith.subf %73, %76 : vector<16x16xf32>
    %78 = math.exp %77 : vector<16x16xf32>
    %cst_28 = arith.constant dense<0.000000e+00> : vector<16xf32>
    %79 = vector.multi_reduction <add>, %78, %cst_28 [1] : vector<16x16xf32> to vector<16xf32>
    %80 = vector.shape_cast %79 : vector<16xf32> to vector<16x1xf32>
    %81 = tpu.reciprocal %80 {approx = true} : vector<16x1xf32> -> vector<16x1xf32>
    %82 = vector.broadcast %81 : vector<16x1xf32> to vector<16x16xf32>
    %83 = arith.mulf %78, %82 : vector<16x16xf32>
    %84 = arith.truncf %83 : vector<16x16xf32> to vector<16x16xbf16>
    %cst_29 = arith.constant dense<0.000000e+00> : vector<16x8xf32>
    %85 = tpu.matmul %84, %71, %cst_29 {dimension_numbers = #tpu.dot_dimension_numbers<[1], [0], [0], [1], [0, 0, 1, 1], [], []>} : vector<16x16xbf16>, vector<16x8xbf16>, vector<16x8xf32> -> vector<16x8xf32>
    %86 = vector.extract_strided_slice %34 {offsets = [0, 24], sizes = [16, 8], strides = [1, 1]} : vector<16x96xbf16> to vector<16x8xbf16>
    %87 = vector.extract_strided_slice %34 {offsets = [0, 56], sizes = [16, 8], strides = [1, 1]} : vector<16x96xbf16> to vector<16x8xbf16>
    %88 = vector.extract_strided_slice %34 {offsets = [0, 88], sizes = [16, 8], strides = [1, 1]} : vector<16x96xbf16> to vector<16x8xbf16>
    "tpu.trace_start"() <{level = 10 : i32, message = "qd,kd->qk"}> : () -> ()
    %cst_30 = arith.constant dense<0.000000e+00> : vector<16x16xf32>
    %89 = tpu.matmul %86, %87, %cst_30 {dimension_numbers = #tpu.dot_dimension_numbers<[1], [1], [0], [0], [0, 0, 1, 0], [], []>} : vector<16x8xbf16>, vector<16x8xbf16>, vector<16x16xf32> -> vector<16x16xf32>
    "tpu.trace_stop"() : () -> ()
    %90 = arith.addf %89, %1 : vector<16x16xf32>
    %cst_31 = arith.constant dense<0xFF800000> : vector<16xf32>
    %91 = vector.multi_reduction <maximumf>, %90, %cst_31 [1] : vector<16x16xf32> to vector<16xf32>
    %92 = vector.shape_cast %91 : vector<16xf32> to vector<16x1xf32>
    %93 = vector.broadcast %92 : vector<16x1xf32> to vector<16x16xf32>
    %94 = arith.subf %90, %93 : vector<16x16xf32>
    %95 = math.exp %94 : vector<16x16xf32>
    %cst_32 = arith.constant dense<0.000000e+00> : vector<16xf32>
    %96 = vector.multi_reduction <add>, %95, %cst_32 [1] : vector<16x16xf32> to vector<16xf32>
    %97 = vector.shape_cast %96 : vector<16xf32> to vector<16x1xf32>
    %98 = tpu.reciprocal %97 {approx = true} : vector<16x1xf32> -> vector<16x1xf32>
    %99 = vector.broadcast %98 : vector<16x1xf32> to vector<16x16xf32>
    %100 = arith.mulf %95, %99 : vector<16x16xf32>
    %101 = arith.truncf %100 : vector<16x16xf32> to vector<16x16xbf16>
    %cst_33 = arith.constant dense<0.000000e+00> : vector<16x8xf32>
    %102 = tpu.matmul %101, %88, %cst_33 {dimension_numbers = #tpu.dot_dimension_numbers<[1], [0], [0], [1], [0, 0, 1, 1], [], []>} : vector<16x16xbf16>, vector<16x8xbf16>, vector<16x8xf32> -> vector<16x8xf32>
    %103 = tpu.concatenate %51, %68, %85, %102 in 1 : vector<16x8xf32>, vector<16x8xf32>, vector<16x8xf32>, vector<16x8xf32> -> vector<16x32xf32>
    %104 = arith.truncf %103 : vector<16x32xf32> to vector<16x32xbf16>
    %c0_34 = arith.constant 0 : index
    %c0_35 = arith.constant 0 : index
    %c0_36 = arith.constant 0 : index
    %105 = vector.load %arg6[%c0_34, %c0_35, %c0_36] : memref<2x32x32xbf16, #tpu.memory_space<vmem>>, vector<1x32x32xbf16>
    %106 = vector.shape_cast %105 : vector<1x32x32xbf16> to vector<32x32xbf16>
    %cst_37 = arith.constant dense<0.000000e+00> : vector<16x32xf32>
    %107 = tpu.matmul %104, %106, %cst_37 {dimension_numbers = #tpu.dot_dimension_numbers<[1], [0], [0], [1], [0, 0, 1, 1], [], []>} : vector<16x32xbf16>, vector<32x32xbf16>, vector<16x32xf32> -> vector<16x32xf32>
    %c0_38 = arith.constant 0 : index
    %c0_39 = arith.constant 0 : index
    %c0_40 = arith.constant 0 : index
    %108 = vector.load %arg7[%c0_38, %c0_39, %c0_40] : memref<2x1x32xf32, #tpu.memory_space<vmem>>, vector<1x1x32xf32>
    %109 = vector.shape_cast %108 : vector<1x1x32xf32> to vector<1x32xf32>
    %110 = vector.broadcast %109 : vector<1x32xf32> to vector<16x32xf32>
    %111 = arith.addf %107, %110 : vector<16x32xf32>
    %112 = arith.addf %25, %111 : vector<16x32xf32>
    %c0_41 = arith.constant 0 : index
    %c0_42 = arith.constant 0 : index
    %c0_43 = arith.constant 0 : index
    %113 = vector.load %arg8[%c0_41, %c0_42, %c0_43] : memref<2x1x32xf32, #tpu.memory_space<vmem>>, vector<1x1x32xf32>
    %114 = vector.shape_cast %113 : vector<1x1x32xf32> to vector<1x32xf32>
    %c0_44 = arith.constant 0 : index
    %c0_45 = arith.constant 0 : index
    %c0_46 = arith.constant 0 : index
    %115 = vector.load %arg9[%c0_44, %c0_45, %c0_46] : memref<2x1x32xf32, #tpu.memory_space<vmem>>, vector<1x1x32xf32>
    %116 = vector.shape_cast %115 : vector<1x1x32xf32> to vector<1x32xf32>
    %cst_47 = arith.constant dense<0.000000e+00> : vector<16xf32>
    %117 = vector.multi_reduction <add>, %112, %cst_47 [1] : vector<16x32xf32> to vector<16xf32>
    %118 = vector.shape_cast %117 : vector<16xf32> to vector<16x1xf32>
    %cst_48 = arith.constant 3.200000e+01 : f32
    %119 = vector.broadcast %cst_48 : f32 to vector<16x1xf32>
    %120 = arith.divf %118, %119 : vector<16x1xf32>
    %121 = vector.broadcast %120 : vector<16x1xf32> to vector<16x32xf32>
    %122 = arith.subf %112, %121 : vector<16x32xf32>
    %123 = arith.mulf %122, %122 : vector<16x32xf32>
    %cst_49 = arith.constant dense<0.000000e+00> : vector<16xf32>
    %124 = vector.multi_reduction <add>, %123, %cst_49 [1] : vector<16x32xf32> to vector<16xf32>
    %125 = vector.shape_cast %124 : vector<16xf32> to vector<16x1xf32>
    %cst_50 = arith.constant 3.200000e+01 : f32
    %126 = vector.broadcast %cst_50 : f32 to vector<16x1xf32>
    %127 = arith.divf %125, %126 : vector<16x1xf32>
    %128 = vector.broadcast %120 : vector<16x1xf32> to vector<16x32xf32>
    %129 = arith.subf %112, %128 : vector<16x32xf32>
    %cst_51 = arith.constant 9.99999996E-13 : f32
    %130 = vector.broadcast %cst_51 : f32 to vector<16x1xf32>
    %131 = arith.addf %127, %130 : vector<16x1xf32>
    %132 = math.rsqrt %131 : vector<16x1xf32>
    %133 = vector.broadcast %132 : vector<16x1xf32> to vector<16x32xf32>
    %134 = arith.mulf %129, %133 : vector<16x32xf32>
    %135 = vector.broadcast %114 : vector<1x32xf32> to vector<16x32xf32>
    %136 = arith.mulf %134, %135 : vector<16x32xf32>
    %137 = vector.broadcast %116 : vector<1x32xf32> to vector<16x32xf32>
    %138 = arith.addf %136, %137 : vector<16x32xf32>
    %139 = arith.truncf %138 : vector<16x32xf32> to vector<16x32xbf16>
    %c0_52 = arith.constant 0 : index
    %c0_53 = arith.constant 0 : index
    %c0_54 = arith.constant 0 : index
    %140 = vector.load %arg10[%c0_52, %c0_53, %c0_54] : memref<2x32x64xbf16, #tpu.memory_space<vmem>>, vector<1x32x64xbf16>
    %141 = vector.shape_cast %140 : vector<1x32x64xbf16> to vector<32x64xbf16>
    %cst_55 = arith.constant dense<0.000000e+00> : vector<16x64xf32>
    %142 = tpu.matmul %139, %141, %cst_55 {dimension_numbers = #tpu.dot_dimension_numbers<[1], [0], [0], [1], [0, 0, 1, 1], [], []>} : vector<16x32xbf16>, vector<32x64xbf16>, vector<16x64xf32> -> vector<16x64xf32>
    %c0_56 = arith.constant 0 : index
    %c0_57 = arith.constant 0 : index
    %c0_58 = arith.constant 0 : index
    %143 = vector.load %arg11[%c0_56, %c0_57, %c0_58] : memref<2x1x64xf32, #tpu.memory_space<vmem>>, vector<1x1x64xf32>
    %144 = vector.shape_cast %143 : vector<1x1x64xf32> to vector<1x64xf32>
    %145 = vector.broadcast %144 : vector<1x64xf32> to vector<16x64xf32>
    %146 = arith.addf %142, %145 : vector<16x64xf32>
    %cst_59 = arith.constant 5.000000e-01 : f32
    %147 = vector.broadcast %cst_59 : f32 to vector<16x64xf32>
    %148 = arith.mulf %147, %146 : vector<16x64xf32>
    %cst_60 = arith.constant 4.471500e-02 : f32
    %149 = vector.broadcast %cst_60 : f32 to vector<16x64xf32>
    %150 = arith.mulf %149, %146 : vector<16x64xf32>
    %151 = arith.mulf %150, %146 : vector<16x64xf32>
    %152 = arith.mulf %151, %146 : vector<16x64xf32>
    %153 = arith.addf %146, %152 : vector<16x64xf32>
    %cst_61 = arith.constant 0.797884583 : f32
    %154 = vector.broadcast %cst_61 : f32 to vector<16x64xf32>
    %155 = arith.mulf %154, %153 : vector<16x64xf32>
    %156 = math.tanh %155 : vector<16x64xf32>
    %cst_62 = arith.constant 1.000000e+00 : f32
    %157 = vector.broadcast %cst_62 : f32 to vector<16x64xf32>
    %158 = arith.addf %157, %156 : vector<16x64xf32>
    %159 = arith.mulf %148, %158 : vector<16x64xf32>
    %160 = arith.truncf %159 : vector<16x64xf32> to vector<16x64xbf16>
    %c0_63 = arith.constant 0 : index
    %c0_64 = arith.constant 0 : index
    %c0_65 = arith.constant 0 : index
    %161 = vector.load %arg12[%c0_63, %c0_64, %c0_65] : memref<2x64x32xbf16, #tpu.memory_space<vmem>>, vector<1x64x32xbf16>
    %162 = vector.shape_cast %161 : vector<1x64x32xbf16> to vector<64x32xbf16>
    %cst_66 = arith.constant dense<0.000000e+00> : vector<16x32xf32>
    %163 = tpu.matmul %160, %162, %cst_66 {dimension_numbers = #tpu.dot_dimension_numbers<[1], [0], [0], [1], [0, 0, 1, 1], [], []>} : vector<16x64xbf16>, vector<64x32xbf16>, vector<16x32xf32> -> vector<16x32xf32>
    %c0_67 = arith.constant 0 : index
    %c0_68 = arith.constant 0 : index
    %c0_69 = arith.constant 0 : index
    %164 = vector.load %arg13[%c0_67, %c0_68, %c0_69] : memref<2x1x32xf32, #tpu.memory_space<vmem>>, vector<1x1x32xf32>
    %165 = vector.shape_cast %164 : vector<1x1x32xf32> to vector<1x32xf32>
    %166 = vector.broadcast %165 : vector<1x32xf32> to vector<16x32xf32>
    %167 = arith.addf %163, %166 : vector<16x32xf32>
    %168 = arith.addf %138, %167 : vector<16x32xf32>
    %c0_70 = arith.constant 0 : index
    %c0_71 = arith.constant 0 : index
    %c0_72 = arith.constant 0 : index
    %169 = vector.load %arg14[%c0_70, %c0_71, %c0_72] : memref<2x1x32xf32, #tpu.memory_space<vmem>>, vector<1x1x32xf32>
    %170 = vector.shape_cast %169 : vector<1x1x32xf32> to vector<1x32xf32>
    %c0_73 = arith.constant 0 : index
    %c0_74 = arith.constant 0 : index
    %c0_75 = arith.constant 0 : index
    %171 = vector.load %arg15[%c0_73, %c0_74, %c0_75] : memref<2x1x32xf32, #tpu.memory_space<vmem>>, vector<1x1x32xf32>
    %172 = vector.shape_cast %171 : vector<1x1x32xf32> to vector<1x32xf32>
    %cst_76 = arith.constant dense<0.000000e+00> : vector<16xf32>
    %173 = vector.multi_reduction <add>, %168, %cst_76 [1] : vector<16x32xf32> to vector<16xf32>
    %174 = vector.shape_cast %173 : vector<16xf32> to vector<16x1xf32>
    %cst_77 = arith.constant 3.200000e+01 : f32
    %175 = vector.broadcast %cst_77 : f32 to vector<16x1xf32>
    %176 = arith.divf %174, %175 : vector<16x1xf32>
    %177 = vector.broadcast %176 : vector<16x1xf32> to vector<16x32xf32>
    %178 = arith.subf %168, %177 : vector<16x32xf32>
    %179 = arith.mulf %178, %178 : vector<16x32xf32>
    %cst_78 = arith.constant dense<0.000000e+00> : vector<16xf32>
    %180 = vector.multi_reduction <add>, %179, %cst_78 [1] : vector<16x32xf32> to vector<16xf32>
    %181 = vector.shape_cast %180 : vector<16xf32> to vector<16x1xf32>
    %cst_79 = arith.constant 3.200000e+01 : f32
    %182 = vector.broadcast %cst_79 : f32 to vector<16x1xf32>
    %183 = arith.divf %181, %182 : vector<16x1xf32>
    %184 = vector.broadcast %176 : vector<16x1xf32> to vector<16x32xf32>
    %185 = arith.subf %168, %184 : vector<16x32xf32>
    %cst_80 = arith.constant 9.99999996E-13 : f32
    %186 = vector.broadcast %cst_80 : f32 to vector<16x1xf32>
    %187 = arith.addf %183, %186 : vector<16x1xf32>
    %188 = math.rsqrt %187 : vector<16x1xf32>
    %189 = vector.broadcast %188 : vector<16x1xf32> to vector<16x32xf32>
    %190 = arith.mulf %185, %189 : vector<16x32xf32>
    %191 = vector.broadcast %170 : vector<1x32xf32> to vector<16x32xf32>
    %192 = arith.mulf %190, %191 : vector<16x32xf32>
    %193 = vector.broadcast %172 : vector<1x32xf32> to vector<16x32xf32>
    %194 = arith.addf %192, %193 : vector<16x32xf32>
    %195 = arith.truncf %194 : vector<16x32xf32> to vector<16x32xbf16>
    %c1 = arith.constant 1 : index
    %c0_81 = arith.constant 0 : index
    %c0_82 = arith.constant 0 : index
    %196 = vector.load %arg4[%c1, %c0_81, %c0_82] : memref<2x32x96xbf16, #tpu.memory_space<vmem>>, vector<1x32x96xbf16>
    %197 = vector.shape_cast %196 : vector<1x32x96xbf16> to vector<32x96xbf16>
    %cst_83 = arith.constant dense<0.000000e+00> : vector<16x96xf32>
    %198 = tpu.matmul %195, %197, %cst_83 {dimension_numbers = #tpu.dot_dimension_numbers<[1], [0], [0], [1], [0, 0, 1, 1], [], []>} : vector<16x32xbf16>, vector<32x96xbf16>, vector<16x96xf32> -> vector<16x96xf32>
    %c1_84 = arith.constant 1 : index
    %c0_85 = arith.constant 0 : index
    %c0_86 = arith.constant 0 : index
    %199 = vector.load %arg5[%c1_84, %c0_85, %c0_86] : memref<2x1x96xf32, #tpu.memory_space<vmem>>, vector<1x1x96xf32>
    %200 = vector.shape_cast %199 : vector<1x1x96xf32> to vector<1x96xf32>
    %201 = vector.broadcast %200 : vector<1x96xf32> to vector<16x96xf32>
    %202 = arith.addf %198, %201 : vector<16x96xf32>
    %203 = arith.truncf %202 : vector<16x96xf32> to vector<16x96xbf16>
    %204 = vector.extract_strided_slice %203 {offsets = [0, 0], sizes = [16, 8], strides = [1, 1]} : vector<16x96xbf16> to vector<16x8xbf16>
    %205 = vector.extract_strided_slice %203 {offsets = [0, 32], sizes = [16, 8], strides = [1, 1]} : vector<16x96xbf16> to vector<16x8xbf16>
    %206 = vector.extract_strided_slice %203 {offsets = [0, 64], sizes = [16, 8], strides = [1, 1]} : vector<16x96xbf16> to vector<16x8xbf16>
    "tpu.trace_start"() <{level = 10 : i32, message = "qd,kd->qk"}> : () -> ()
    %cst_87 = arith.constant dense<0.000000e+00> : vector<16x16xf32>
    %207 = tpu.matmul %204, %205, %cst_87 {dimension_numbers = #tpu.dot_dimension_numbers<[1], [1], [0], [0], [0, 0, 1, 0], [], []>} : vector<16x8xbf16>, vector<16x8xbf16>, vector<16x16xf32> -> vector<16x16xf32>
    "tpu.trace_stop"() : () -> ()
    %208 = arith.addf %207, %1 : vector<16x16xf32>
    %cst_88 = arith.constant dense<0xFF800000> : vector<16xf32>
    %209 = vector.multi_reduction <maximumf>, %208, %cst_88 [1] : vector<16x16xf32> to vector<16xf32>
    %210 = vector.shape_cast %209 : vector<16xf32> to vector<16x1xf32>
    %211 = vector.broadcast %210 : vector<16x1xf32> to vector<16x16xf32>
    %212 = arith.subf %208, %211 : vector<16x16xf32>
    %213 = math.exp %212 : vector<16x16xf32>
    %cst_89 = arith.constant dense<0.000000e+00> : vector<16xf32>
    %214 = vector.multi_reduction <add>, %213, %cst_89 [1] : vector<16x16xf32> to vector<16xf32>
    %215 = vector.shape_cast %214 : vector<16xf32> to vector<16x1xf32>
    %216 = tpu.reciprocal %215 {approx = true} : vector<16x1xf32> -> vector<16x1xf32>
    %217 = vector.broadcast %216 : vector<16x1xf32> to vector<16x16xf32>
    %218 = arith.mulf %213, %217 : vector<16x16xf32>
    %219 = arith.truncf %218 : vector<16x16xf32> to vector<16x16xbf16>
    %cst_90 = arith.constant dense<0.000000e+00> : vector<16x8xf32>
    %220 = tpu.matmul %219, %206, %cst_90 {dimension_numbers = #tpu.dot_dimension_numbers<[1], [0], [0], [1], [0, 0, 1, 1], [], []>} : vector<16x16xbf16>, vector<16x8xbf16>, vector<16x8xf32> -> vector<16x8xf32>
    %221 = vector.extract_strided_slice %203 {offsets = [0, 8], sizes = [16, 8], strides = [1, 1]} : vector<16x96xbf16> to vector<16x8xbf16>
    %222 = vector.extract_strided_slice %203 {offsets = [0, 40], sizes = [16, 8], strides = [1, 1]} : vector<16x96xbf16> to vector<16x8xbf16>
    %223 = vector.extract_strided_slice %203 {offsets = [0, 72], sizes = [16, 8], strides = [1, 1]} : vector<16x96xbf16> to vector<16x8xbf16>
    "tpu.trace_start"() <{level = 10 : i32, message = "qd,kd->qk"}> : () -> ()
    %cst_91 = arith.constant dense<0.000000e+00> : vector<16x16xf32>
    %224 = tpu.matmul %221, %222, %cst_91 {dimension_numbers = #tpu.dot_dimension_numbers<[1], [1], [0], [0], [0, 0, 1, 0], [], []>} : vector<16x8xbf16>, vector<16x8xbf16>, vector<16x16xf32> -> vector<16x16xf32>
    "tpu.trace_stop"() : () -> ()
    %225 = arith.addf %224, %1 : vector<16x16xf32>
    %cst_92 = arith.constant dense<0xFF800000> : vector<16xf32>
    %226 = vector.multi_reduction <maximumf>, %225, %cst_92 [1] : vector<16x16xf32> to vector<16xf32>
    %227 = vector.shape_cast %226 : vector<16xf32> to vector<16x1xf32>
    %228 = vector.broadcast %227 : vector<16x1xf32> to vector<16x16xf32>
    %229 = arith.subf %225, %228 : vector<16x16xf32>
    %230 = math.exp %229 : vector<16x16xf32>
    %cst_93 = arith.constant dense<0.000000e+00> : vector<16xf32>
    %231 = vector.multi_reduction <add>, %230, %cst_93 [1] : vector<16x16xf32> to vector<16xf32>
    %232 = vector.shape_cast %231 : vector<16xf32> to vector<16x1xf32>
    %233 = tpu.reciprocal %232 {approx = true} : vector<16x1xf32> -> vector<16x1xf32>
    %234 = vector.broadcast %233 : vector<16x1xf32> to vector<16x16xf32>
    %235 = arith.mulf %230, %234 : vector<16x16xf32>
    %236 = arith.truncf %235 : vector<16x16xf32> to vector<16x16xbf16>
    %cst_94 = arith.constant dense<0.000000e+00> : vector<16x8xf32>
    %237 = tpu.matmul %236, %223, %cst_94 {dimension_numbers = #tpu.dot_dimension_numbers<[1], [0], [0], [1], [0, 0, 1, 1], [], []>} : vector<16x16xbf16>, vector<16x8xbf16>, vector<16x8xf32> -> vector<16x8xf32>
    %238 = vector.extract_strided_slice %203 {offsets = [0, 16], sizes = [16, 8], strides = [1, 1]} : vector<16x96xbf16> to vector<16x8xbf16>
    %239 = vector.extract_strided_slice %203 {offsets = [0, 48], sizes = [16, 8], strides = [1, 1]} : vector<16x96xbf16> to vector<16x8xbf16>
    %240 = vector.extract_strided_slice %203 {offsets = [0, 80], sizes = [16, 8], strides = [1, 1]} : vector<16x96xbf16> to vector<16x8xbf16>
    "tpu.trace_start"() <{level = 10 : i32, message = "qd,kd->qk"}> : () -> ()
    %cst_95 = arith.constant dense<0.000000e+00> : vector<16x16xf32>
    %241 = tpu.matmul %238, %239, %cst_95 {dimension_numbers = #tpu.dot_dimension_numbers<[1], [1], [0], [0], [0, 0, 1, 0], [], []>} : vector<16x8xbf16>, vector<16x8xbf16>, vector<16x16xf32> -> vector<16x16xf32>
    "tpu.trace_stop"() : () -> ()
    %242 = arith.addf %241, %1 : vector<16x16xf32>
    %cst_96 = arith.constant dense<0xFF800000> : vector<16xf32>
    %243 = vector.multi_reduction <maximumf>, %242, %cst_96 [1] : vector<16x16xf32> to vector<16xf32>
    %244 = vector.shape_cast %243 : vector<16xf32> to vector<16x1xf32>
    %245 = vector.broadcast %244 : vector<16x1xf32> to vector<16x16xf32>
    %246 = arith.subf %242, %245 : vector<16x16xf32>
    %247 = math.exp %246 : vector<16x16xf32>
    %cst_97 = arith.constant dense<0.000000e+00> : vector<16xf32>
    %248 = vector.multi_reduction <add>, %247, %cst_97 [1] : vector<16x16xf32> to vector<16xf32>
    %249 = vector.shape_cast %248 : vector<16xf32> to vector<16x1xf32>
    %250 = tpu.reciprocal %249 {approx = true} : vector<16x1xf32> -> vector<16x1xf32>
    %251 = vector.broadcast %250 : vector<16x1xf32> to vector<16x16xf32>
    %252 = arith.mulf %247, %251 : vector<16x16xf32>
    %253 = arith.truncf %252 : vector<16x16xf32> to vector<16x16xbf16>
    %cst_98 = arith.constant dense<0.000000e+00> : vector<16x8xf32>
    %254 = tpu.matmul %253, %240, %cst_98 {dimension_numbers = #tpu.dot_dimension_numbers<[1], [0], [0], [1], [0, 0, 1, 1], [], []>} : vector<16x16xbf16>, vector<16x8xbf16>, vector<16x8xf32> -> vector<16x8xf32>
    %255 = vector.extract_strided_slice %203 {offsets = [0, 24], sizes = [16, 8], strides = [1, 1]} : vector<16x96xbf16> to vector<16x8xbf16>
    %256 = vector.extract_strided_slice %203 {offsets = [0, 56], sizes = [16, 8], strides = [1, 1]} : vector<16x96xbf16> to vector<16x8xbf16>
    %257 = vector.extract_strided_slice %203 {offsets = [0, 88], sizes = [16, 8], strides = [1, 1]} : vector<16x96xbf16> to vector<16x8xbf16>
    "tpu.trace_start"() <{level = 10 : i32, message = "qd,kd->qk"}> : () -> ()
    %cst_99 = arith.constant dense<0.000000e+00> : vector<16x16xf32>
    %258 = tpu.matmul %255, %256, %cst_99 {dimension_numbers = #tpu.dot_dimension_numbers<[1], [1], [0], [0], [0, 0, 1, 0], [], []>} : vector<16x8xbf16>, vector<16x8xbf16>, vector<16x16xf32> -> vector<16x16xf32>
    "tpu.trace_stop"() : () -> ()
    %259 = arith.addf %258, %1 : vector<16x16xf32>
    %cst_100 = arith.constant dense<0xFF800000> : vector<16xf32>
    %260 = vector.multi_reduction <maximumf>, %259, %cst_100 [1] : vector<16x16xf32> to vector<16xf32>
    %261 = vector.shape_cast %260 : vector<16xf32> to vector<16x1xf32>
    %262 = vector.broadcast %261 : vector<16x1xf32> to vector<16x16xf32>
    %263 = arith.subf %259, %262 : vector<16x16xf32>
    %264 = math.exp %263 : vector<16x16xf32>
    %cst_101 = arith.constant dense<0.000000e+00> : vector<16xf32>
    %265 = vector.multi_reduction <add>, %264, %cst_101 [1] : vector<16x16xf32> to vector<16xf32>
    %266 = vector.shape_cast %265 : vector<16xf32> to vector<16x1xf32>
    %267 = tpu.reciprocal %266 {approx = true} : vector<16x1xf32> -> vector<16x1xf32>
    %268 = vector.broadcast %267 : vector<16x1xf32> to vector<16x16xf32>
    %269 = arith.mulf %264, %268 : vector<16x16xf32>
    %270 = arith.truncf %269 : vector<16x16xf32> to vector<16x16xbf16>
    %cst_102 = arith.constant dense<0.000000e+00> : vector<16x8xf32>
    %271 = tpu.matmul %270, %257, %cst_102 {dimension_numbers = #tpu.dot_dimension_numbers<[1], [0], [0], [1], [0, 0, 1, 1], [], []>} : vector<16x16xbf16>, vector<16x8xbf16>, vector<16x8xf32> -> vector<16x8xf32>
    %272 = tpu.concatenate %220, %237, %254, %271 in 1 : vector<16x8xf32>, vector<16x8xf32>, vector<16x8xf32>, vector<16x8xf32> -> vector<16x32xf32>
    %273 = arith.truncf %272 : vector<16x32xf32> to vector<16x32xbf16>
    %c1_103 = arith.constant 1 : index
    %c0_104 = arith.constant 0 : index
    %c0_105 = arith.constant 0 : index
    %274 = vector.load %arg6[%c1_103, %c0_104, %c0_105] : memref<2x32x32xbf16, #tpu.memory_space<vmem>>, vector<1x32x32xbf16>
    %275 = vector.shape_cast %274 : vector<1x32x32xbf16> to vector<32x32xbf16>
    %cst_106 = arith.constant dense<0.000000e+00> : vector<16x32xf32>
    %276 = tpu.matmul %273, %275, %cst_106 {dimension_numbers = #tpu.dot_dimension_numbers<[1], [0], [0], [1], [0, 0, 1, 1], [], []>} : vector<16x32xbf16>, vector<32x32xbf16>, vector<16x32xf32> -> vector<16x32xf32>
    %c1_107 = arith.constant 1 : index
    %c0_108 = arith.constant 0 : index
    %c0_109 = arith.constant 0 : index
    %277 = vector.load %arg7[%c1_107, %c0_108, %c0_109] : memref<2x1x32xf32, #tpu.memory_space<vmem>>, vector<1x1x32xf32>
    %278 = vector.shape_cast %277 : vector<1x1x32xf32> to vector<1x32xf32>
    %279 = vector.broadcast %278 : vector<1x32xf32> to vector<16x32xf32>
    %280 = arith.addf %276, %279 : vector<16x32xf32>
    %281 = arith.addf %194, %280 : vector<16x32xf32>
    %c1_110 = arith.constant 1 : index
    %c0_111 = arith.constant 0 : index
    %c0_112 = arith.constant 0 : index
    %282 = vector.load %arg8[%c1_110, %c0_111, %c0_112] : memref<2x1x32xf32, #tpu.memory_space<vmem>>, vector<1x1x32xf32>
    %283 = vector.shape_cast %282 : vector<1x1x32xf32> to vector<1x32xf32>
    %c1_113 = arith.constant 1 : index
    %c0_114 = arith.constant 0 : index
    %c0_115 = arith.constant 0 : index
    %284 = vector.load %arg9[%c1_113, %c0_114, %c0_115] : memref<2x1x32xf32, #tpu.memory_space<vmem>>, vector<1x1x32xf32>
    %285 = vector.shape_cast %284 : vector<1x1x32xf32> to vector<1x32xf32>
    %cst_116 = arith.constant dense<0.000000e+00> : vector<16xf32>
    %286 = vector.multi_reduction <add>, %281, %cst_116 [1] : vector<16x32xf32> to vector<16xf32>
    %287 = vector.shape_cast %286 : vector<16xf32> to vector<16x1xf32>
    %cst_117 = arith.constant 3.200000e+01 : f32
    %288 = vector.broadcast %cst_117 : f32 to vector<16x1xf32>
    %289 = arith.divf %287, %288 : vector<16x1xf32>
    %290 = vector.broadcast %289 : vector<16x1xf32> to vector<16x32xf32>
    %291 = arith.subf %281, %290 : vector<16x32xf32>
    %292 = arith.mulf %291, %291 : vector<16x32xf32>
    %cst_118 = arith.constant dense<0.000000e+00> : vector<16xf32>
    %293 = vector.multi_reduction <add>, %292, %cst_118 [1] : vector<16x32xf32> to vector<16xf32>
    %294 = vector.shape_cast %293 : vector<16xf32> to vector<16x1xf32>
    %cst_119 = arith.constant 3.200000e+01 : f32
    %295 = vector.broadcast %cst_119 : f32 to vector<16x1xf32>
    %296 = arith.divf %294, %295 : vector<16x1xf32>
    %297 = vector.broadcast %289 : vector<16x1xf32> to vector<16x32xf32>
    %298 = arith.subf %281, %297 : vector<16x32xf32>
    %cst_120 = arith.constant 9.99999996E-13 : f32
    %299 = vector.broadcast %cst_120 : f32 to vector<16x1xf32>
    %300 = arith.addf %296, %299 : vector<16x1xf32>
    %301 = math.rsqrt %300 : vector<16x1xf32>
    %302 = vector.broadcast %301 : vector<16x1xf32> to vector<16x32xf32>
    %303 = arith.mulf %298, %302 : vector<16x32xf32>
    %304 = vector.broadcast %283 : vector<1x32xf32> to vector<16x32xf32>
    %305 = arith.mulf %303, %304 : vector<16x32xf32>
    %306 = vector.broadcast %285 : vector<1x32xf32> to vector<16x32xf32>
    %307 = arith.addf %305, %306 : vector<16x32xf32>
    %308 = arith.truncf %307 : vector<16x32xf32> to vector<16x32xbf16>
    %c1_121 = arith.constant 1 : index
    %c0_122 = arith.constant 0 : index
    %c0_123 = arith.constant 0 : index
    %309 = vector.load %arg10[%c1_121, %c0_122, %c0_123] : memref<2x32x64xbf16, #tpu.memory_space<vmem>>, vector<1x32x64xbf16>
    %310 = vector.shape_cast %309 : vector<1x32x64xbf16> to vector<32x64xbf16>
    %cst_124 = arith.constant dense<0.000000e+00> : vector<16x64xf32>
    %311 = tpu.matmul %308, %310, %cst_124 {dimension_numbers = #tpu.dot_dimension_numbers<[1], [0], [0], [1], [0, 0, 1, 1], [], []>} : vector<16x32xbf16>, vector<32x64xbf16>, vector<16x64xf32> -> vector<16x64xf32>
    %c1_125 = arith.constant 1 : index
    %c0_126 = arith.constant 0 : index
    %c0_127 = arith.constant 0 : index
    %312 = vector.load %arg11[%c1_125, %c0_126, %c0_127] : memref<2x1x64xf32, #tpu.memory_space<vmem>>, vector<1x1x64xf32>
    %313 = vector.shape_cast %312 : vector<1x1x64xf32> to vector<1x64xf32>
    %314 = vector.broadcast %313 : vector<1x64xf32> to vector<16x64xf32>
    %315 = arith.addf %311, %314 : vector<16x64xf32>
    %cst_128 = arith.constant 5.000000e-01 : f32
    %316 = vector.broadcast %cst_128 : f32 to vector<16x64xf32>
    %317 = arith.mulf %316, %315 : vector<16x64xf32>
    %cst_129 = arith.constant 4.471500e-02 : f32
    %318 = vector.broadcast %cst_129 : f32 to vector<16x64xf32>
    %319 = arith.mulf %318, %315 : vector<16x64xf32>
    %320 = arith.mulf %319, %315 : vector<16x64xf32>
    %321 = arith.mulf %320, %315 : vector<16x64xf32>
    %322 = arith.addf %315, %321 : vector<16x64xf32>
    %cst_130 = arith.constant 0.797884583 : f32
    %323 = vector.broadcast %cst_130 : f32 to vector<16x64xf32>
    %324 = arith.mulf %323, %322 : vector<16x64xf32>
    %325 = math.tanh %324 : vector<16x64xf32>
    %cst_131 = arith.constant 1.000000e+00 : f32
    %326 = vector.broadcast %cst_131 : f32 to vector<16x64xf32>
    %327 = arith.addf %326, %325 : vector<16x64xf32>
    %328 = arith.mulf %317, %327 : vector<16x64xf32>
    %329 = arith.truncf %328 : vector<16x64xf32> to vector<16x64xbf16>
    %c1_132 = arith.constant 1 : index
    %c0_133 = arith.constant 0 : index
    %c0_134 = arith.constant 0 : index
    %330 = vector.load %arg12[%c1_132, %c0_133, %c0_134] : memref<2x64x32xbf16, #tpu.memory_space<vmem>>, vector<1x64x32xbf16>
    %331 = vector.shape_cast %330 : vector<1x64x32xbf16> to vector<64x32xbf16>
    %cst_135 = arith.constant dense<0.000000e+00> : vector<16x32xf32>
    %332 = tpu.matmul %329, %331, %cst_135 {dimension_numbers = #tpu.dot_dimension_numbers<[1], [0], [0], [1], [0, 0, 1, 1], [], []>} : vector<16x64xbf16>, vector<64x32xbf16>, vector<16x32xf32> -> vector<16x32xf32>
    %c1_136 = arith.constant 1 : index
    %c0_137 = arith.constant 0 : index
    %c0_138 = arith.constant 0 : index
    %333 = vector.load %arg13[%c1_136, %c0_137, %c0_138] : memref<2x1x32xf32, #tpu.memory_space<vmem>>, vector<1x1x32xf32>
    %334 = vector.shape_cast %333 : vector<1x1x32xf32> to vector<1x32xf32>
    %335 = vector.broadcast %334 : vector<1x32xf32> to vector<16x32xf32>
    %336 = arith.addf %332, %335 : vector<16x32xf32>
    %337 = arith.addf %307, %336 : vector<16x32xf32>
    %c1_139 = arith.constant 1 : index
    %c0_140 = arith.constant 0 : index
    %c0_141 = arith.constant 0 : index
    %338 = vector.load %arg14[%c1_139, %c0_140, %c0_141] : memref<2x1x32xf32, #tpu.memory_space<vmem>>, vector<1x1x32xf32>
    %339 = vector.shape_cast %338 : vector<1x1x32xf32> to vector<1x32xf32>
    %c1_142 = arith.constant 1 : index
    %c0_143 = arith.constant 0 : index
    %c0_144 = arith.constant 0 : index
    %340 = vector.load %arg15[%c1_142, %c0_143, %c0_144] : memref<2x1x32xf32, #tpu.memory_space<vmem>>, vector<1x1x32xf32>
    %341 = vector.shape_cast %340 : vector<1x1x32xf32> to vector<1x32xf32>
    %cst_145 = arith.constant dense<0.000000e+00> : vector<16xf32>
    %342 = vector.multi_reduction <add>, %337, %cst_145 [1] : vector<16x32xf32> to vector<16xf32>
    %343 = vector.shape_cast %342 : vector<16xf32> to vector<16x1xf32>
    %cst_146 = arith.constant 3.200000e+01 : f32
    %344 = vector.broadcast %cst_146 : f32 to vector<16x1xf32>
    %345 = arith.divf %343, %344 : vector<16x1xf32>
    %346 = vector.broadcast %345 : vector<16x1xf32> to vector<16x32xf32>
    %347 = arith.subf %337, %346 : vector<16x32xf32>
    %348 = arith.mulf %347, %347 : vector<16x32xf32>
    %cst_147 = arith.constant dense<0.000000e+00> : vector<16xf32>
    %349 = vector.multi_reduction <add>, %348, %cst_147 [1] : vector<16x32xf32> to vector<16xf32>
    %350 = vector.shape_cast %349 : vector<16xf32> to vector<16x1xf32>
    %cst_148 = arith.constant 3.200000e+01 : f32
    %351 = vector.broadcast %cst_148 : f32 to vector<16x1xf32>
    %352 = arith.divf %350, %351 : vector<16x1xf32>
    %353 = vector.broadcast %345 : vector<16x1xf32> to vector<16x32xf32>
    %354 = arith.subf %337, %353 : vector<16x32xf32>
    %cst_149 = arith.constant 9.99999996E-13 : f32
    %355 = vector.broadcast %cst_149 : f32 to vector<16x1xf32>
    %356 = arith.addf %352, %355 : vector<16x1xf32>
    %357 = math.rsqrt %356 : vector<16x1xf32>
    %358 = vector.broadcast %357 : vector<16x1xf32> to vector<16x32xf32>
    %359 = arith.mulf %354, %358 : vector<16x32xf32>
    %360 = vector.broadcast %339 : vector<1x32xf32> to vector<16x32xf32>
    %361 = arith.mulf %359, %360 : vector<16x32xf32>
    %362 = vector.broadcast %341 : vector<1x32xf32> to vector<16x32xf32>
    %363 = arith.addf %361, %362 : vector<16x32xf32>
    %c0_150 = arith.constant 0 : index
    %c0_151 = arith.constant 0 : index
    %364 = vector.load %arg16[%c0_150, %c0_151] : memref<16x32xf32, #tpu.memory_space<vmem>>, vector<16x32xf32>
    tpu.vector_store %arg16[%c0_150, %c0_151], %363 {strides = array<i32>} : memref<16x32xf32, #tpu.memory_space<vmem>>, vector<16x32xf32>,
    return
  }
}

</mosaic_0001>

<bundles_post_ra>
// kernel: mul.14
= control target key start
LH: loop header
LB: loop body
LE: loop exit
PB: predicated region body
PF: predicated region fallthrough
CT: control target
= control target key end

     0   :  { %vm8_vm0 = vcmask 64512   ;;  %vm14_vm1 = vcmask 130112   ;;  %s42_s0 = inlined_call_operand.vmem [shape: f32[2,8], index: 0, kind: input, shape index: {}]   ;;  %s43_s1 = inlined_call_operand.vmem [shape: f32[16], index: 1, kind: output, shape index: {}]  }
   0x1   :  { %v5_v0 = vld [vmem:[%s42_s0] sm:$0x3]  ;;  %s25_s0 = smov 8  }
   0x2   :  { %6 = vst [vmem:[#allocation1] sm:$0x3] %v5_v0 }
   0x9   :  { %v11_v1 = vld [vmem:[#allocation1 + $0x1] sm:$0x1]   ;;  %v7_v2 = vld [vmem:[#allocation1] sm:$0x1]  }
   0xa   :  { %12 = vrot.lane.b32.xlu0 %v11_v1, %s25_s0  ;;  %9 = vst.msk [vmem:[#allocation0] sm:$0x1] %vm8_vm0, %v7_v2  }
  0x7c   :  { %v13_v3 = vpop.permute.xlu0 %12  }
  0x7d   :  { %15 = vst.msk [vmem:[#allocation0] sm:$0x1] %vm14_vm1, %v13_v3  }
  0x84   :  { %v20_v4 = vld [vmem:[#allocation0] sm:$0x1] }
  0x85   :  { %23 = vst [vmem:[%s43_s1] sm:$0x1] %v20_v4 }

// kernel: luke_base_layer_forward.1
= control target key start
LH: loop header
LB: loop body
LE: loop exit
PB: predicated region body
PF: predicated region fallthrough
CT: control target
= control target key end

     0   :  { %s2970_s0 = inlined_call_operand.vmem [shape: f32[16,32], index: 0, kind: input, shape index: {}]   ;;  %s2971_s1 = inlined_call_operand.vmem [shape: f32[16,16], index: 1, kind: input, shape index: {}]   ;;  %s2972_s2 = inlined_call_operand.vmem [shape: f32[1,32], index: 2, kind: input, shape index: {}]   ;;  %s2973_s3 = inlined_call_operand.vmem [shape: f32[1,32], index: 3, kind: input, shape index: {}]   ;;  %s2974_s4 = inlined_call_operand.vmem [shape: bf16[2,32,96], index: 4, kind: input, shape index: {}]   ;;  %s2975_s5 = inlined_call_operand.vmem [shape: f32[2,1,96], index: 5, kind: input, shape index: {}]   ;;  %s2976_s6 = inlined_call_operand.vmem [shape: bf16[2,32,32], index: 6, kind: input, shape index: {}]   ;;  %s2977_s7 = inlined_call_operand.vmem [shape: f32[2,1,32], index: 7, kind: input, shape index: {}]   ;;  %s2978_s8 = inlined_call_operand.vmem [shape: f32[2,1,32], index: 8, kind: input, shape index: {}]   ;;  %s2979_s9 = inlined_call_operand.vmem [shape: f32[2,1,32], index: 9, kind: input, shape index: {}]   ;;  %s2980_s10 = inlined_call_operand.vmem [shape: bf16[2,32,64], index: 10, kind: input, shape index: {}]   ;;  %s2981_s11 = inlined_call_operand.vmem [shape: f32[2,1,64], index: 11, kind: input, shape index: {}]   ;;  %s2982_s12 = inlined_call_operand.vmem [shape: bf16[2,64,32], index: 12, kind: input, shape index: {}]   ;;  %s2983_s13 = inlined_call_operand.vmem [shape: f32[2,1,32], index: 13, kind: input, shape index: {}]   ;;  %s2984_s14 = inlined_call_operand.vmem [shape: f32[2,1,32], index: 14, kind: input, shape index: {}]   ;;  %s2985_s15 = inlined_call_operand.vmem [shape: f32[2,1,32], index: 15, kind: input, shape index: {}]   ;;  %s2986_s16 = inlined_call_operand.hbm [shape: f32[16,32], index: 16, kind: output, shape index: {}]  }
   0x1   :  { %2993 = sst [smem:[#allocation5_spill]] %s2970_s0 }
   0x2   :  { %s2994_s23 = sld [smem:[#allocation5_spill]]  ;;  %vm61_vm0 = vcmask 261120  }
   0x8   :  { %v55_v0 = vld [vmem:[%s2994_s23] sm:$0xff]  ;;  %v56_v1 = vld [vmem:[%s2994_s23 + $0x8] sm:$0xff] }
   0x9   :  { %v62_v2 = vsel %vm61_vm0, %v55_v0, 0.0  ;;  %v65_v3 = vsel %vm61_vm0, %v56_v1, 0.0 }
   0xa   :  { %63 = vadd.xlane.f32.xlu0 %v62_v2 }
   0xe   :  { %66 = vadd.xlane.f32.xlu0 %v65_v3 }
   0xf   :  { %21 = vsyncpa [#allocation3], 0  ;;  %v2329_v14 = vld [vmem:[%s2974_s4 + $0x8] sm:$0xff]   ;;  %v2463_v15 = vmov 0.0   ;;  %vm2464_vm1 = vmmov 0   ;;  %v2330_v16 = vld [vmem:[%s2974_s4] sm:$0xff]  }
  0x10   :  { %2113 = vmatprep.subr.bf16.mxu1 %v2463_v15  ;;  %2117 = vmatprep.mubr.msk.bf16.mxu1 %vm2464_vm1, %v2463_v15  ;;  %v1963_v25 = vld [vmem:[%s2972_s2] ss:$0 sm:$0xff]  ;;  %s2466_s20 = smov 96   ;;  %s2467_s21 = smov 120   ;;  %vm177_vm2 = vcmask 64512   ;;  %vm225_vm3 = vcmask 130048  }
  0x11   :  { %2114 = vmatpush3.bf16.msra.mxu1 %v2329_v14  ;;  %2127 = vmatprep.subr.bf16.mxu0 %v2463_v15  ;;  %v1964_v29 = vld [vmem:[%s2973_s3] ss:$0 sm:$0xff]  ;;  %s2465_s3 = smov 88   ;;  %s2468_s22 = smov 112   ;;  %v2654_v57 = vld [vmem:[%s2971_s1 + $0x8] sm:$0xff]  ;;  %vm687_vm4 = vcmask 195584  }
  0x12   :  { %2115 = vmatprep.subr.bf16.mxu1 %v2463_v15  ;;  %2129 = vmatprep.mubr.msk.bf16.mxu0 %vm2464_vm1, %v2463_v15  ;;  %v1965_v35 = vld [vmem:[%s2975_s5] ss:$0 sm:$0xff]  ;;  %s2469_s23 = smov 80   ;;  %s2470_s24 = smov 104   ;;  %vm930_vm5 = vcmask 523264  }
  0x13   :  { %s2471_s25 = smov 72   ;;  %v2648_v53 = vld [vmem:[%s2971_s1] sm:$0xff]  ;;  %s2472_s1 = smov 64  }
  0x14   :  { %s2473_s30 = smov 48   ;;  %s2474_s0 = smov 40  }
  0x15   :  { %2116 = vmatpush3.bf16.msra.mxu1 %v2330_v16  ;;  %s2992_s17 = smov 56   ;;  %s2990_s19 = smov 8  }
  0x16   :  { %2121 = vmatprep.subr.bf16.mxu1 %v2463_v15  ;;  %s2989_s28 = smov 16   ;;  %s2988_s29 = smov 24  }
  0x93   :  { %v64_v4 = vpop.xlane.xlu0 %63 }
  0x94   :  { %v69_v5 = vmul.f32 0.03125, %v64_v4 }
  0x96   :  { %v71_v6 = vsub.f32 %v55_v0, %v69_v5 }
  0x97   :  { %v67_v7 = vpop.xlane.xlu0 %66 }
  0x98   :  { %v70_v8 = vmul.f32 0.03125, %v67_v7  ;;  %v73_v9 = vmul.f32 %v71_v6, %v71_v6 }
  0x9a   :  { %v72_v10 = vsub.f32 %v56_v1, %v70_v8  ;;  %v75_v11 = vsel %vm61_vm0, %v73_v9, 0.0 }
  0x9b   :  { %76 = vadd.xlane.f32.xlu1 %v75_v11 }
  0x9c   :  { %v74_v12 = vmul.f32 %v72_v10, %v72_v10 }
  0x9e   :  { %v78_v13 = vsel %vm61_vm0, %v74_v12, 0.0 }
  0x9f   :  { %79 = vadd.xlane.f32.xlu1 %v78_v13 }
 0x124   :  { %v77_v17 = vpop.xlane.xlu1 %76 }
 0x125   :  { %v81_v18 = vmul.f32 0.03125, %v77_v17 }
 0x127   :  { %v83_v19 = vadd.f32 1e-12, %v81_v18 }
 0x128   :  { %v80_v20 = vpop.xlane.xlu1 %79 }
 0x129   :  { %2349 = vrsqrt.f32 %v83_v19  ;;  %v82_v21 = vmul.f32 0.03125, %v80_v20 }
 0x12b   :  { %v84_v22 = vadd.f32 1e-12, %v82_v21 }
 0x12d   :  { %2351 = vrsqrt.f32 %v84_v22 }
 0x136   :  { %v2350_v23 = vpop.eup %2349 }
 0x137   :  { %v87_v24 = vmul.f32 %v2350_v23, %v71_v6 }
 0x139   :  { %v95_v28 = vmul.f32 %v1963_v25, %v87_v24 }
 0x13a   :  { %v2352_v26 = vpop.eup %2351 }
 0x13b   :  { %v88_v27 = vmul.f32 %v2352_v26, %v72_v10  ;;  %v2596_v31 = vadd.f32 %v1964_v29, %v95_v28 }
 0x13d   :  { %v96_v30 = vmul.f32 %v1963_v25, %v88_v27 }
 0x13f   :  { %v2598_v32 = vadd.f32 %v1964_v29, %v96_v30 }
 0x141   :  { %v105_v33 = vpack.c.bf16 %v2598_v32, %v2596_v31 }
 0x143   :  { %2118 = vmatmul.mubr.msk.bf16.vlgmr.msra.gmra.mxu1 %vm61_vm0, %v105_v33 }
 0x144   :  { %2123 = vmatprep.mubr.msk.bf16.mxu1 %vm2464_vm1, %v2463_v15 }
 0x203   :  { %v166_v34 = vpop.f32.mrf.mxu1 }
 0x204   :  { %v167_v38 = vadd.f32 %v1965_v35, %v166_v34 }
 0x205   :  { %v2119_v36 = vpop.f32.mrf.mxu1 }
 0x207   :  { %v169_v37 = vpop.f32.mrf.mxu1 }
 0x208   :  { %v170_v39 = vadd.f32 %v1965_v35, %v169_v37 }
 0x209   :  { %v2120_v40 = vpop.f32.mrf.mxu1 }
 0x20a   :  { %v2608_v41 = vpack.c.bf16 %v170_v39, %v167_v38 }
 0x20c   :  { %298 = vrot.lane.b32.xlu1 %v2608_v41, %s2465_s3  ;;  %175 = vrot.lane.b32.xlu0 %v2608_v41, %s2466_s20 }
 0x210   :  { %296 = vrot.lane.b32.xlu1 %v2608_v41, %s2467_s21  ;;  %417 = vrot.lane.b32.xlu0 %v2608_v41, %s2468_s22 }
 0x214   :  { %419 = vrot.lane.b32.xlu1 %v2608_v41, %s2469_s23  ;;  %538 = vrot.lane.b32.xlu0 %v2608_v41, %s2470_s24 }
 0x218   :  { %540 = vrot.lane.b32.xlu1 %v2608_v41, %s2471_s25 }
 0x27e   :  { %v176_v42 = vpop.permute.xlu0 %175  ;;  %v299_v44 = vpop.permute.xlu1 %298 }
 0x27f   :  { %v182_v43 = vsel %vm177_vm2, %v176_v42, 0  ;;  %v304_v46 = vsel %vm177_vm2, %v299_v44, 0 }
 0x280   :  { %2122 = vmatpush3.bf16.xpose.msra.mxu1 %v182_v43 }
 0x281   :  { %2133 = vmatprep.subr.bf16.mxu1 %v2463_v15 }
 0x282   :  { %v297_v45 = vpop.permute.xlu1 %296  ;;  %v418_v50 = vpop.permute.xlu0 %417 }
 0x286   :  { %v420_v47 = vpop.permute.xlu1 %419  ;;  %v539_v52 = vpop.permute.xlu0 %538 }
 0x287   :  { %2124 = vmatmul.mubr.msk.bf16.vlgmr.msra.gmra.mxu1 %vm177_vm2, %v2608_v41  ;;  %v425_v48 = vsel %vm177_vm2, %v420_v47, 0 }
 0x288   :  { %2134 = vmatpush3.bf16.xpose.msra.mxu1 %v304_v46  ;;  %2135 = vmatprep.mubr.msk.bf16.mxu1 %vm2464_vm1, %v2463_v15 }
 0x289   :  { %2145 = vmatprep.subr.bf16.mxu1 %v2463_v15 }
 0x28a   :  { %v541_v49 = vpop.permute.xlu1 %540 }
 0x28b   :  { %v546_v51 = vsel %vm177_vm2, %v541_v49, 0 }
 0x28f   :  { %2136 = vmatmul.mubr.msk.bf16.vlgmr.msra.gmra.mxu1 %vm177_vm2, %v297_v45 }
 0x290   :  { %2146 = vmatpush3.bf16.xpose.msra.mxu1 %v425_v48  ;;  %2147 = vmatprep.mubr.msk.bf16.mxu1 %vm2464_vm1, %v2463_v15 }
 0x291   :  { %2157 = vmatprep.subr.bf16.mxu1 %v2463_v15 }
 0x297   :  { %2148 = vmatmul.mubr.msk.bf16.vlgmr.msra.gmra.mxu1 %vm177_vm2, %v418_v50 }
 0x298   :  { %2158 = vmatpush3.bf16.xpose.msra.mxu1 %v546_v51  ;;  %2159 = vmatprep.mubr.msk.bf16.mxu1 %vm2464_vm1, %v2463_v15 }
 0x299   :  { %2169 = vmatprep.subr.bf16.mxu1 %v2463_v15 }
 0x29f   :  { %2160 = vmatmul.mubr.msk.bf16.vlgmr.msra.gmra.mxu1 %vm177_vm2, %v539_v52 }
 0x2a0   :  { %2173 = vmatprep.mubr.msk.bf16.mxu1 %vm2464_vm1, %v2463_v15 }
 0x347   :  { %v218_v54 = vpop.f32.mrf.mxu1 }
 0x348   :  { %v219_v55 = vadd.f32 %v218_v54, %v2648_v53 }
 0x349   :  { %v2125_v56 = vpop.f32.mrf.mxu1 }
 0x34a   :  { %v226_v58 = vsel %vm225_vm3, %v219_v55, -inf }
 0x34b   :  { %227 = vmax.xlane.f32.xlu1 %v226_v58  ;;  %v221_v59 = vpop.f32.mrf.mxu1 }
 0x34c   :  { %v222_v60 = vadd.f32 %v221_v59, %v2654_v57 }
 0x34d   :  { %v2126_v61 = vpop.f32.mrf.mxu1 }
 0x34e   :  { %v229_v62 = vsel %vm225_vm3, %v222_v60, -inf }
 0x34f   :  { %230 = vmax.xlane.f32.xlu0 %v229_v62  ;;  %v340_v63 = vpop.f32.mrf.mxu1 }
 0x350   :  { %v341_v0 = vadd.f32 %v340_v63, %v2648_v53 }
 0x351   :  { %v2137_v1 = vpop.f32.mrf.mxu1 }
 0x352   :  { %v347_v2 = vsel %vm225_vm3, %v341_v0, -inf }
 0x353   :  { %348 = vmax.xlane.f32.xlu0 %v347_v2  ;;  %v343_v3 = vpop.f32.mrf.mxu1 }
 0x354   :  { %v344_v4 = vadd.f32 %v343_v3, %v2654_v57 }
 0x355   :  { %v2138_v5 = vpop.f32.mrf.mxu1 }
 0x356   :  { %v350_v6 = vsel %vm225_vm3, %v344_v4, -inf }
 0x357   :  { %351 = vmax.xlane.f32.xlu0 %v350_v6  ;;  %v461_v7 = vpop.f32.mrf.mxu1 }
 0x358   :  { %v462_v8 = vadd.f32 %v461_v7, %v2648_v53 }
 0x359   :  { %v2149_v9 = vpop.f32.mrf.mxu1 }
 0x35a   :  { %v468_v10 = vsel %vm225_vm3, %v462_v8, -inf }
 0x35b   :  { %469 = vmax.xlane.f32.xlu1 %v468_v10  ;;  %v464_v11 = vpop.f32.mrf.mxu1 }
 0x35c   :  { %v465_v12 = vadd.f32 %v464_v11, %v2654_v57 }
 0x35d   :  { %v2150_v13 = vpop.f32.mrf.mxu1 }
 0x35e   :  { %v471_v14 = vsel %vm225_vm3, %v465_v12, -inf }
 0x35f   :  { %472 = vmax.xlane.f32.xlu0 %v471_v14  ;;  %v582_v16 = vpop.f32.mrf.mxu1 }
 0x360   :  { %v583_v17 = vadd.f32 %v582_v16, %v2648_v53 }
 0x361   :  { %v2161_v18 = vpop.f32.mrf.mxu1 }
 0x362   :  { %v589_v19 = vsel %vm225_vm3, %v583_v17, -inf }
 0x363   :  { %590 = vmax.xlane.f32.xlu1 %v589_v19  ;;  %v585_v20 = vpop.f32.mrf.mxu1 }
 0x364   :  { %v586_v21 = vadd.f32 %v585_v20, %v2654_v57 }
 0x365   :  { %v2162_v22 = vpop.f32.mrf.mxu1 }
 0x366   :  { %v592_v23 = vsel %vm225_vm3, %v586_v21, -inf }
 0x367   :  { %593 = vmax.xlane.f32.xlu0 %v592_v23 }
 0x374   :  { %249 = vrot.lane.b32.xlu1 %v2608_v41, %s2472_s1 }
 0x3d4   :  { %v228_v24 = vpop.xlane.xlu1 %227 }
 0x3d5   :  { %v232_v25 = vsub.f32 %v219_v55, %v228_v24 }
 0x3d7   :  { %v234_v26 = vmul.f32 1.442695, %v232_v25 }
 0x3d8   :  { %v231_v27 = vpop.xlane.xlu0 %230 }
 0x3d9   :  { %2353 = vpow2.f32 %v234_v26  ;;  %v233_v28 = vsub.f32 %v222_v60, %v231_v27 }
 0x3db   :  { %v236_v29 = vmul.f32 1.442695, %v233_v28 }
 0x3dc   :  { %v349_v30 = vpop.xlane.xlu0 %348 }
 0x3dd   :  { %2355 = vpow2.f32 %v236_v29  ;;  %v353_v33 = vsub.f32 %v341_v0, %v349_v30 }
 0x3df   :  { %v355_v34 = vmul.f32 1.442695, %v353_v33 }
 0x3e0   :  { %v352_v35 = vpop.xlane.xlu0 %351 }
 0x3e1   :  { %2357 = vpow2.f32 %v355_v34  ;;  %v354_v36 = vsub.f32 %v344_v4, %v352_v35 }
 0x3e3   :  { %v357_v37 = vmul.f32 1.442695, %v354_v36 }
 0x3e4   :  { %v470_v38 = vpop.xlane.xlu1 %469 }
 0x3e5   :  { %2359 = vpow2.f32 %v357_v37  ;;  %v474_v39 = vsub.f32 %v462_v8, %v470_v38 }
 0x3e6   :  { %v2354_v40 = vpop.eup %2353 }
 0x3e7   :  { %v476_v42 = vmul.f32 1.442695, %v474_v39  ;;  %v238_v43 = vsel %vm225_vm3, %v2354_v40, 0.0 }
 0x3e8   :  { %v473_v44 = vpop.xlane.xlu0 %472  ;;  %239 = vadd.xlane.f32.xlu1 %v238_v43 }
 0x3e9   :  { %2361 = vpow2.f32 %v476_v42  ;;  %v475_v45 = vsub.f32 %v465_v12, %v473_v44 }
 0x3ea   :  { %v2356_v46 = vpop.eup %2355 }
 0x3eb   :  { %v478_v47 = vmul.f32 1.442695, %v475_v45  ;;  %v241_v48 = vsel %vm225_vm3, %v2356_v46, 0.0 }
 0x3ec   :  { %v591_v49 = vpop.xlane.xlu1 %590  ;;  %242 = vadd.xlane.f32.xlu0 %v241_v48 }
 0x3ed   :  { %2363 = vpow2.f32 %v478_v47  ;;  %v595_v50 = vsub.f32 %v583_v17, %v591_v49  ;;  %v2331_v47 = vld [vmem:[%s2976_s6 + $0x8] sm:$0xff]  }
 0x3ee   :  { %v2358_v51 = vpop.eup %2357  ;;  %2170 = vmatpush3.bf16.msra.mxu1 %v2331_v47  ;;  %v1981_v47 = vld [vmem:[%s2978_s8] ss:$0 sm:$0xff] }
 0x3ef   :  { %v597_v52 = vmul.f32 1.442695, %v595_v50  ;;  %v359_v54 = vsel %vm225_vm3, %v2358_v51, 0.0  ;;  %2171 = vmatprep.subr.bf16.mxu1 %v2463_v15 }
 0x3f0   :  { %360 = vadd.xlane.f32.xlu1 %v359_v54  ;;  %v250_v55 = vpop.permute.xlu1 %249  ;;  %v594_v56 = vpop.xlane.xlu0 %593 }
 0x3f1   :  { %2365 = vpow2.f32 %v597_v52  ;;  %v596_v58 = vsub.f32 %v586_v21, %v594_v56  ;;  %2128 = vmatpush3.bf16.msra.mxu0 %v250_v55  ;;  %v2332_v52 = vld [vmem:[%s2976_s6] sm:$0xff]  }
 0x3f2   :  { %v2360_v59 = vpop.eup %2359  ;;  %2139 = vmatprep.subr.bf16.mxu0 %v2463_v15  ;;  %2172 = vmatpush3.bf16.msra.mxu1 %v2332_v52 }
 0x3f3   :  { %v599_v60 = vmul.f32 1.442695, %v596_v58  ;;  %v362_v61 = vsel %vm225_vm3, %v2360_v59, 0.0  ;;  %2185 = vmatprep.subr.bf16.mxu1 %v2463_v15 }
 0x3f4   :  { %363 = vadd.xlane.f32.xlu0 %v362_v61 }
 0x3f5   :  { %2367 = vpow2.f32 %v599_v60 }
 0x3f6   :  { %v2362_v62 = vpop.eup %2361 }
 0x3f7   :  { %v480_v63 = vsel %vm225_vm3, %v2362_v62, 0.0 }
 0x3f8   :  { %481 = vadd.xlane.f32.xlu1 %v480_v63 }
 0x3fa   :  { %v2364_v0 = vpop.eup %2363 }
 0x3fb   :  { %v483_v1 = vsel %vm225_vm3, %v2364_v0, 0.0 }
 0x3fc   :  { %484 = vadd.xlane.f32.xlu0 %v483_v1 }
 0x3fe   :  { %v2366_v2 = vpop.eup %2365 }
 0x3ff   :  { %v601_v3 = vsel %vm225_vm3, %v2366_v2, 0.0 }
 0x400   :  { %602 = vadd.xlane.f32.xlu1 %v601_v3 }
 0x402   :  { %v2368_v4 = vpop.eup %2367 }
 0x403   :  { %v604_v5 = vsel %vm225_vm3, %v2368_v4, 0.0 }
 0x404   :  { %605 = vadd.xlane.f32.xlu0 %v604_v5 }
 0x411   :  { %491 = vrot.lane.b32.xlu1 %v2608_v41, %s2473_s30 }
 0x415   :  { %612 = vrot.lane.b32.xlu1 %v2608_v41, %s2474_s0 }
 0x41a   :  { %370 = vrot.lane.b32.xlu0 %v2608_v41, %s2992_s17 }
 0x471   :  { %v240_v6 = vpop.xlane.xlu1 %239 }
 0x472   :  { %2369 = vrcp.f32 %v240_v6 }
 0x475   :  { %v243_v7 = vpop.xlane.xlu0 %242 }
 0x476   :  { %2371 = vrcp.f32 %v243_v7 }
 0x479   :  { %v361_v9 = vpop.xlane.xlu1 %360 }
 0x47d   :  { %v364_v8 = vpop.xlane.xlu0 %363 }
 0x47e   :  { %2373 = vrcp.f32 %v364_v8 }
 0x47f   :  { %v2370_v10 = vpop.eup %2369  ;;  %2375 = vrcp.f32 %v361_v9 }
 0x480   :  { %v246_v12 = vmul.f32 %v2370_v10, %v2354_v40 }
 0x481   :  { %v482_v16 = vpop.xlane.xlu1 %481 }
 0x483   :  { %v2372_v11 = vpop.eup %2371 }
 0x484   :  { %v247_v13 = vmul.f32 %v2372_v11, %v2356_v46 }
 0x485   :  { %v485_v14 = vpop.xlane.xlu0 %484 }
 0x486   :  { %v248_v17 = vpack.c.bf16 %v247_v13, %v246_v12  ;;  %2377 = vrcp.f32 %v485_v14 }
 0x487   :  { %2379 = vrcp.f32 %v482_v16  ;;  %v1977_v16 = vld [vmem:[%s2977_s7] ss:$0 sm:$0xff] }
 0x488   :  { %2130 = vmatmul.mubr.msk.bf16.vlgmr.msra.gmra.mxu0 %vm225_vm3, %v248_v17 }
 0x489   :  { %2141 = vmatprep.mubr.msk.bf16.mxu0 %vm2464_vm1, %v2463_v15  ;;  %v603_v20 = vpop.xlane.xlu1 %602 }
 0x48b   :  { %v2374_v41 = vpop.eup %2373 }
 0x48c   :  { %v2376_v19 = vpop.eup %2375  ;;  %v368_v21 = vmul.f32 %v2374_v41, %v2360_v59 }
 0x48d   :  { %v606_v18 = vpop.xlane.xlu0 %605  ;;  %v367_v23 = vmul.f32 %v2376_v19, %v2358_v51  ;;  %v492_v26 = vpop.permute.xlu1 %491 }
 0x48e   :  { %2381 = vrcp.f32 %v606_v18 }
 0x48f   :  { %2383 = vrcp.f32 %v603_v20  ;;  %v369_v24 = vpack.c.bf16 %v368_v21, %v367_v23 }
 0x491   :  { %v371_v22 = vpop.permute.xlu0 %370  ;;  %v613_v34 = vpop.permute.xlu1 %612 }
 0x492   :  { %2140 = vmatpush3.bf16.msra.mxu0 %v371_v22 }
 0x493   :  { %2151 = vmatprep.subr.bf16.mxu0 %v2463_v15  ;;  %v2378_v25 = vpop.eup %2377 }
 0x494   :  { %v2380_v27 = vpop.eup %2379  ;;  %v489_v28 = vmul.f32 %v2378_v25, %v2364_v0 }
 0x495   :  { %2142 = vmatmul.mubr.msk.bf16.vlgmr.msra.gmra.mxu0 %vm225_vm3, %v369_v24  ;;  %v488_v29 = vmul.f32 %v2380_v27, %v2362_v62 }
 0x496   :  { %2152 = vmatpush3.bf16.msra.mxu0 %v492_v26  ;;  %2153 = vmatprep.mubr.msk.bf16.mxu0 %vm2464_vm1, %v2463_v15 }
 0x497   :  { %2163 = vmatprep.subr.bf16.mxu0 %v2463_v15  ;;  %v490_v30 = vpack.c.bf16 %v489_v28, %v488_v29 }
 0x49b   :  { %v2382_v33 = vpop.eup %2381 }
 0x49c   :  { %v2384_v35 = vpop.eup %2383  ;;  %v610_v36 = vmul.f32 %v2382_v33, %v2368_v4 }
 0x49d   :  { %2154 = vmatmul.mubr.msk.bf16.vlgmr.msra.gmra.mxu0 %vm225_vm3, %v490_v30  ;;  %v609_v37 = vmul.f32 %v2384_v35, %v2366_v2 }
 0x49e   :  { %2164 = vmatpush3.bf16.msra.mxu0 %v613_v34  ;;  %2165 = vmatprep.mubr.msk.bf16.mxu0 %vm2464_vm1, %v2463_v15 }
 0x49f   :  { %2177 = vmatprep.subr.bf16.mxu0 %v2463_v15  ;;  %v611_v38 = vpack.c.bf16 %v610_v36, %v609_v37  ;;  %v2334_v37 = vld [vmem:[%s2980_s10] sm:$0xff]  }
 0x4a5   :  { %2166 = vmatmul.mubr.msk.bf16.vlgmr.msra.gmra.mxu0 %vm225_vm3, %v611_v38 }
 0x4a6   :  { %2181 = vmatprep.mubr.msk.bf16.mxu0 %vm2464_vm1, %v2463_v15 }
 0x548   :  { %v289_v39 = vpop.f32.mrf.mxu0 }
 0x54a   :  { %v2131_v40 = vpop.f32.mrf.mxu0 }
 0x54c   :  { %v292_v42 = vpop.f32.mrf.mxu0 }
 0x54e   :  { %v2132_v43 = vpop.f32.mrf.mxu0 }
 0x555   :  { %v410_v44 = vpop.f32.mrf.mxu0 }
 0x557   :  { %v2143_v45 = vpop.f32.mrf.mxu0 }
 0x559   :  { %v413_v46 = vpop.f32.mrf.mxu0 }
 0x55a   :  { %v2299_v48 = vpack.i.bf16 %v413_v46, %v410_v44 }
 0x55b   :  { %v2144_v49 = vpop.f32.mrf.mxu0 }
 0x55c   :  { %2300 = vrot.lane.b32.xlu1 %v2299_v48, %s2990_s19 }
 0x55d   :  { %v531_v50 = vpop.f32.mrf.mxu0 }
 0x55f   :  { %v2155_v51 = vpop.f32.mrf.mxu0 }
 0x560   :  { %v1982_v51 = vld [vmem:[%s2979_s9] ss:$0 sm:$0xff] }
 0x561   :  { %v534_v54 = vpop.f32.mrf.mxu0 }
 0x562   :  { %v2304_v55 = vpack.i.bf16 %v534_v54, %v531_v50 }
 0x563   :  { %v2156_v56 = vpop.f32.mrf.mxu0 }
 0x564   :  { %2305 = vrot.lane.b32.xlu0 %v2304_v55, %s2989_s28 }
 0x565   :  { %v652_v58 = vpop.f32.mrf.mxu0 }
 0x567   :  { %v2167_v59 = vpop.f32.mrf.mxu0 }
 0x568   :  { %v2336_v59 = vld [vmem:[%s2982_s12 + $0x10] sm:$0xff]  }
 0x569   :  { %v655_v60 = vpop.f32.mrf.mxu0 }
 0x56a   :  { %v2309_v61 = vpack.i.bf16 %v655_v60, %v652_v58  ;;  %v2335_v58 = vld [vmem:[%s2982_s12 + $0x18] sm:$0xff]   ;;  %v2337_v60 = vld [vmem:[%s2982_s12 + $0x8] sm:$0xff]  }
 0x56b   :  { %v2168_v62 = vpop.f32.mrf.mxu0 }
 0x56c   :  { %2310 = vrot.lane.b32.xlu1 %v2309_v61, %s2988_s29  ;;  %v2338_v61 = vld [vmem:[%s2982_s12] sm:$0xff]  }
 0x56d   :  { %v1983_v62 = vld [vmem:[%s2981_s11] ss:$0 sm:$0xff] }
 0x5ce   :  { %v2301_v63 = vpop.permute.xlu1 %2300 }
 0x5cf   :  { %v2303_v1 = vunpack.i.h.bf16 %v2301_v63  ;;  %v2302_v2 = vunpack.i.l.bf16 %v2301_v63 }
 0x5d1   :  { %v684_v6 = vsel %vm177_vm2, %v292_v42, %v2303_v1  ;;  %v683_v7 = vsel %vm177_vm2, %v289_v39, %v2302_v2 }
 0x5d6   :  { %v2306_v0 = vpop.permute.xlu0 %2305 }
 0x5d7   :  { %v2308_v3 = vunpack.i.h.bf16 %v2306_v0  ;;  %v2307_v4 = vunpack.i.l.bf16 %v2306_v0 }
 0x5d9   :  { %v686_v10 = vsel %vm225_vm3, %v684_v6, %v2308_v3  ;;  %v685_v11 = vsel %vm225_vm3, %v683_v7, %v2307_v4 }
 0x5de   :  { %v2311_v5 = vpop.permute.xlu1 %2310 }
 0x5df   :  { %v2313_v8 = vunpack.i.h.bf16 %v2311_v5  ;;  %v2312_v9 = vunpack.i.l.bf16 %v2311_v5 }
 0x5e1   :  { %v689_v12 = vsel %vm687_vm4, %v686_v10, %v2313_v8  ;;  %v688_v13 = vsel %vm687_vm4, %v685_v11, %v2312_v9 }
 0x5e2   :  { %v690_v14 = vpack.c.bf16 %v689_v12, %v688_v13 }
 0x5e4   :  { %2174 = vmatmul.mubr.msk.bf16.vlgmr.msra.gmra.mxu1 %vm61_vm0, %v690_v14 }
 0x5e5   :  { %2193 = vmatprep.mubr.msk.bf16.mxu1 %vm2464_vm1, %v2463_v15  ;;  %2186 = vmatpush3.bf16.msra.mxu1 %v2335_v58  ;;  %v1993_v58 = vld [vmem:[%s2984_s14] ss:$0 sm:$0xff] }
 0x5e6   :  { %2187 = vmatprep.subr.bf16.mxu1 %v2463_v15 }
 0x5e9   :  { %2188 = vmatpush3.bf16.msra.mxu1 %v2336_v59 }
 0x5ea   :  { %2189 = vmatprep.subr.bf16.mxu1 %v2463_v15 }
 0x5ed   :  { %2190 = vmatpush3.bf16.msra.mxu1 %v2337_v60 }
 0x5ee   :  { %2191 = vmatprep.subr.bf16.mxu1 %v2463_v15 }
 0x5f1   :  { %2192 = vmatpush3.bf16.msra.mxu1 %v2338_v61 }
 0x5f2   :  { %2211 = vmatprep.subr.bf16.mxu1 %v2463_v15 }
 0x6a4   :  { %v751_v17 = vpop.f32.mrf.mxu1 }
 0x6a5   :  { %v752_v41 = vadd.f32 %v1977_v16, %v751_v17 }
 0x6a6   :  { %v2175_v18 = vpop.f32.mrf.mxu1 }
 0x6a7   :  { %v758_v19 = vadd.f32 %v752_v41, %v2596_v31 }
 0x6a8   :  { %v754_v20 = vpop.f32.mrf.mxu1 }
 0x6a9   :  { %v755_v21 = vadd.f32 %v1977_v16, %v754_v20  ;;  %v762_v22 = vsel %vm61_vm0, %v758_v19, 0.0 }
 0x6aa   :  { %763 = vadd.xlane.f32.xlu0 %v762_v22  ;;  %v2176_v23 = vpop.f32.mrf.mxu1 }
 0x6ab   :  { %v759_v24 = vadd.f32 %v755_v21, %v2598_v32  ;;  %v2333_v32 = vld [vmem:[%s2980_s10 + $0x8] sm:$0xff]  }
 0x6ac   :  { %2178 = vmatpush3.bf16.msra.mxu0 %v2333_v32 }
 0x6ad   :  { %v765_v25 = vsel %vm61_vm0, %v759_v24, 0.0  ;;  %2179 = vmatprep.subr.bf16.mxu0 %v2463_v15 }
 0x6ae   :  { %766 = vadd.xlane.f32.xlu1 %v765_v25 }
 0x6b0   :  { %2180 = vmatpush3.bf16.msra.mxu0 %v2334_v37 }
 0x6b1   :  { %2197 = vmatprep.subr.bf16.mxu0 %v2463_v15 }
 0x733   :  { %v764_v26 = vpop.xlane.xlu0 %763 }
 0x734   :  { %v768_v27 = vmul.f32 0.03125, %v764_v26 }
 0x736   :  { %v770_v28 = vsub.f32 %v758_v19, %v768_v27 }
 0x737   :  { %v767_v29 = vpop.xlane.xlu1 %766 }
 0x738   :  { %v769_v30 = vmul.f32 0.03125, %v767_v29  ;;  %v772_v33 = vmul.f32 %v770_v28, %v770_v28 }
 0x73a   :  { %v771_v34 = vsub.f32 %v759_v24, %v769_v30  ;;  %v774_v31 = vsel %vm61_vm0, %v772_v33, 0.0  ;;  %v1987_v24 = vld [vmem:[%s2983_s13] ss:$0 sm:$0xff] }
 0x73b   :  { %775 = vadd.xlane.f32.xlu0 %v774_v31 }
 0x73c   :  { %v773_v35 = vmul.f32 %v771_v34, %v771_v34 }
 0x73e   :  { %v777_v36 = vsel %vm61_vm0, %v773_v35, 0.0 }
 0x73f   :  { %778 = vadd.xlane.f32.xlu0 %v777_v36 }
 0x7c4   :  { %v776_v38 = vpop.xlane.xlu0 %775 }
 0x7c5   :  { %v780_v39 = vmul.f32 0.03125, %v776_v38 }
 0x7c7   :  { %v782_v40 = vadd.f32 1e-12, %v780_v39 }
 0x7c8   :  { %v779_v42 = vpop.xlane.xlu0 %778 }
 0x7c9   :  { %2385 = vrsqrt.f32 %v782_v40  ;;  %v781_v43 = vmul.f32 0.03125, %v779_v42 }
 0x7cb   :  { %v783_v44 = vadd.f32 1e-12, %v781_v43 }
 0x7cd   :  { %2387 = vrsqrt.f32 %v783_v44 }
 0x7d6   :  { %v2386_v45 = vpop.eup %2385 }
 0x7d7   :  { %v786_v46 = vmul.f32 %v2386_v45, %v770_v28 }
 0x7d9   :  { %v794_v50 = vmul.f32 %v1981_v47, %v786_v46  ;;  %v2339_v46 = vld [vmem:[%s2974_s4 + $0x18] sm:$0xff]  }
 0x7da   :  { %v2388_v48 = vpop.eup %2387 }
 0x7db   :  { %v787_v49 = vmul.f32 %v2388_v48, %v771_v34  ;;  %v802_v54 = vadd.f32 %v1982_v51, %v794_v50 }
 0x7dd   :  { %v795_v52 = vmul.f32 %v1981_v47, %v787_v49  ;;  %v2340_v47 = vld [vmem:[%s2974_s4 + $0x10] sm:$0xff]  }
 0x7df   :  { %v803_v55 = vadd.f32 %v1982_v51, %v795_v52 }
 0x7e1   :  { %v804_v56 = vpack.c.bf16 %v803_v55, %v802_v54 }
 0x7e3   :  { %2182 = vmatmul.mubr.msk.bf16.vlgmr.msra.gmra.mxu0 %vm61_vm0, %v804_v56 }
 0x7e4   :  { %2201 = vmatprep.mubr.msk.bf16.mxu0 %vm2464_vm1, %v2463_v15  ;;  %2198 = vmatpush3.bf16.msra.mxu0 %v2339_v46 }
 0x7e5   :  { %2199 = vmatprep.subr.bf16.mxu0 %v2463_v15 }
 0x7e8   :  { %2200 = vmatpush3.bf16.msra.mxu0 %v2340_v47 }
 0x7e9   :  { %2205 = vmatprep.subr.bf16.mxu0 %v2463_v15 }
 0x8a3   :  { %v865_v63 = vpop.f32.mrf.mxu0 }
 0x8a4   :  { %v866_v0 = vadd.f32 %v1983_v62, %v865_v63 }
 0x8a5   :  { %v2183_v1 = vpop.f32.mrf.mxu0 }
 0x8a6   :  { %v874_v2 = vmul.f32 0.044715, %v866_v0  ;;  %v872_v18 = vmul.f32 0.5, %v866_v0 }
 0x8a7   :  { %v868_v3 = vpop.f32.mrf.mxu0 }
 0x8a8   :  { %v876_v4 = vmul.f32 %v874_v2, %v866_v0  ;;  %v869_v5 = vadd.f32 %v1983_v62, %v868_v3  ;;  %v1994_v62 = vld [vmem:[%s2985_s15] ss:$0 sm:$0xff] }
 0x8a9   :  { %v2184_v6 = vpop.f32.mrf.mxu0 }
 0x8aa   :  { %v878_v7 = vmul.f32 %v876_v4, %v866_v0  ;;  %v875_v8 = vmul.f32 0.044715, %v869_v5  ;;  %v873_v19 = vmul.f32 0.5, %v869_v5  ;;  %v2000_v4 = vld [vmem:[%s2975_s5 + $0x1] ss:$0 sm:$0xff]  ;;  %s2995_s5 = smov 56  }
 0x8ac   :  { %v880_v9 = vadd.f32 %v878_v7, %v866_v0  ;;  %v877_v10 = vmul.f32 %v875_v8, %v869_v5 }
 0x8ae   :  { %v882_v11 = vmul.f32 0.7978846, %v880_v9  ;;  %v879_v12 = vmul.f32 %v877_v10, %v869_v5 }
 0x8b0   :  { %2389 = vtanh.f32 %v882_v11  ;;  %v881_v13 = vadd.f32 %v879_v12, %v869_v5 }
 0x8b2   :  { %v883_v14 = vmul.f32 0.7978846, %v881_v13 }
 0x8b4   :  { %2391 = vtanh.f32 %v883_v14 }
 0x8bd   :  { %v2390_v16 = vpop.eup %2389 }
 0x8be   :  { %v886_v17 = vadd.f32 1.0, %v2390_v16 }
 0x8c0   :  { %v888_v21 = vmul.f32 %v886_v17, %v872_v18 }
 0x8c1   :  { %v2392_v41 = vpop.eup %2391 }
 0x8c2   :  { %v887_v20 = vadd.f32 1.0, %v2392_v41 }
 0x8c4   :  { %v889_v22 = vmul.f32 %v887_v20, %v873_v19 }
 0x8c6   :  { %v890_v23 = vpack.c.bf16 %v889_v22, %v888_v21 }
 0x8c8   :  { %2194 = vmatmul.mubr.msk.bf16.vlgmr.msra.gmra.mxu1 %vm930_vm5, %v890_v23 }
 0x8c9   :  { %2213 = vmatprep.mubr.msk.bf16.mxu1 %vm2464_vm1, %v2463_v15 }
 0x988   :  { %v968_v25 = vpop.f32.mrf.mxu1 }
 0x989   :  { %v969_v26 = vadd.f32 %v1987_v24, %v968_v25 }
 0x98a   :  { %v2195_v27 = vpop.f32.mrf.mxu1 }
 0x98b   :  { %v975_v28 = vadd.f32 %v969_v26, %v802_v54 }
 0x98c   :  { %v971_v29 = vpop.f32.mrf.mxu1 }
 0x98d   :  { %v972_v30 = vadd.f32 %v1987_v24, %v971_v29  ;;  %v979_v33 = vsel %vm61_vm0, %v975_v28, 0.0 }
 0x98e   :  { %980 = vadd.xlane.f32.xlu0 %v979_v33  ;;  %v2196_v34 = vpop.f32.mrf.mxu1 }
 0x98f   :  { %v976_v31 = vadd.f32 %v972_v30, %v803_v55 }
 0x991   :  { %v982_v35 = vsel %vm61_vm0, %v976_v31, 0.0 }
 0x992   :  { %983 = vadd.xlane.f32.xlu1 %v982_v35 }
 0xa17   :  { %v981_v36 = vpop.xlane.xlu0 %980 }
 0xa18   :  { %v985_v32 = vmul.f32 0.03125, %v981_v36 }
 0xa1a   :  { %v987_v37 = vsub.f32 %v975_v28, %v985_v32 }
 0xa1b   :  { %v984_v38 = vpop.xlane.xlu1 %983 }
 0xa1c   :  { %v986_v39 = vmul.f32 0.03125, %v984_v38  ;;  %v989_v40 = vmul.f32 %v987_v37, %v987_v37 }
 0xa1e   :  { %v988_v42 = vsub.f32 %v976_v31, %v986_v39  ;;  %v991_v43 = vsel %vm61_vm0, %v989_v40, 0.0 }
 0xa1f   :  { %992 = vadd.xlane.f32.xlu0 %v991_v43 }
 0xa20   :  { %v990_v44 = vmul.f32 %v988_v42, %v988_v42 }
 0xa22   :  { %v994_v45 = vsel %vm61_vm0, %v990_v44, 0.0 }
 0xa23   :  { %995 = vadd.xlane.f32.xlu1 %v994_v45 }
 0xaa8   :  { %v993_v48 = vpop.xlane.xlu0 %992 }
 0xaa9   :  { %v997_v49 = vmul.f32 0.03125, %v993_v48 }
 0xaab   :  { %v999_v50 = vadd.f32 1e-12, %v997_v49 }
 0xaac   :  { %v996_v51 = vpop.xlane.xlu1 %995 }
 0xaad   :  { %2393 = vrsqrt.f32 %v999_v50  ;;  %v998_v52 = vmul.f32 0.03125, %v996_v51 }
 0xaaf   :  { %v1000_v54 = vadd.f32 1e-12, %v998_v52 }
 0xab1   :  { %2395 = vrsqrt.f32 %v1000_v54 }
 0xaba   :  { %v2394_v55 = vpop.eup %2393 }
 0xabb   :  { %v1003_v56 = vmul.f32 %v2394_v55, %v987_v37 }
 0xabd   :  { %v1011_v61 = vmul.f32 %v1993_v58, %v1003_v56 }
 0xabe   :  { %v2396_v59 = vpop.eup %2395 }
 0xabf   :  { %v1004_v60 = vmul.f32 %v2396_v59, %v988_v42  ;;  %v2792_v0 = vadd.f32 %v1994_v62, %v1011_v61 }
 0xac1   :  { %v1012_v63 = vmul.f32 %v1993_v58, %v1004_v60 }
 0xac3   :  { %v2794_v1 = vadd.f32 %v1994_v62, %v1012_v63 }
 0xac5   :  { %v1021_v2 = vpack.c.bf16 %v2794_v1, %v2792_v0 }
 0xac7   :  { %2202 = vmatmul.mubr.msk.bf16.vlgmr.msra.gmra.mxu0 %vm61_vm0, %v1021_v2 }
 0xac8   :  { %2207 = vmatprep.mubr.msk.bf16.mxu0 %vm2464_vm1, %v2463_v15 }
 0xb87   :  { %v1084_v3 = vpop.f32.mrf.mxu0 }
 0xb88   :  { %v1085_v7 = vadd.f32 %v2000_v4, %v1084_v3 }
 0xb89   :  { %v2203_v5 = vpop.f32.mrf.mxu0 }
 0xb8b   :  { %v1087_v6 = vpop.f32.mrf.mxu0 }
 0xb8c   :  { %v1088_v8 = vadd.f32 %v2000_v4, %v1087_v6 }
 0xb8d   :  { %v2204_v9 = vpop.f32.mrf.mxu0 }
 0xb8e   :  { %v2804_v10 = vpack.c.bf16 %v1088_v8, %v1085_v7 }
 0xb90   :  { %1214 = vrot.lane.b32.xlu1 %v2804_v10, %s2465_s3  ;;  %1093 = vrot.lane.b32.xlu0 %v2804_v10, %s2466_s20 }
 0xb94   :  { %1212 = vrot.lane.b32.xlu1 %v2804_v10, %s2467_s21  ;;  %1333 = vrot.lane.b32.xlu0 %v2804_v10, %s2468_s22  ;;  %s2996_s21 = smov 8  }
 0xb98   :  { %1335 = vrot.lane.b32.xlu1 %v2804_v10, %s2469_s23  ;;  %1454 = vrot.lane.b32.xlu0 %v2804_v10, %s2470_s24  ;;  %s2997_s24 = smov 16  }
 0xb9c   :  { %1456 = vrot.lane.b32.xlu1 %v2804_v10, %s2471_s25  ;;  %s2998_s25 = smov 24  }
 0xc02   :  { %v1094_v11 = vpop.permute.xlu0 %1093  ;;  %v1215_v13 = vpop.permute.xlu1 %1214 }
 0xc03   :  { %v1099_v12 = vsel %vm177_vm2, %v1094_v11, 0  ;;  %v1220_v16 = vsel %vm177_vm2, %v1215_v13, 0 }
 0xc04   :  { %2206 = vmatpush3.bf16.xpose.msra.mxu0 %v1099_v12 }
 0xc05   :  { %2217 = vmatprep.subr.bf16.mxu0 %v2463_v15 }
 0xc06   :  { %v1213_v14 = vpop.permute.xlu1 %1212  ;;  %v1334_v19 = vpop.permute.xlu0 %1333 }
 0xc0a   :  { %v1336_v17 = vpop.permute.xlu1 %1335  ;;  %v1455_v21 = vpop.permute.xlu0 %1454 }
 0xc0b   :  { %2208 = vmatmul.mubr.msk.bf16.vlgmr.msra.gmra.mxu0 %vm177_vm2, %v2804_v10  ;;  %v1341_v41 = vsel %vm177_vm2, %v1336_v17, 0 }
 0xc0c   :  { %2218 = vmatpush3.bf16.xpose.msra.mxu0 %v1220_v16  ;;  %2219 = vmatprep.mubr.msk.bf16.mxu0 %vm2464_vm1, %v2463_v15 }
 0xc0d   :  { %2229 = vmatprep.subr.bf16.mxu0 %v2463_v15 }
 0xc0e   :  { %v1457_v18 = vpop.permute.xlu1 %1456 }
 0xc0f   :  { %v1462_v20 = vsel %vm177_vm2, %v1457_v18, 0 }
 0xc13   :  { %2220 = vmatmul.mubr.msk.bf16.vlgmr.msra.gmra.mxu0 %vm177_vm2, %v1213_v14 }
 0xc14   :  { %2230 = vmatpush3.bf16.xpose.msra.mxu0 %v1341_v41  ;;  %2231 = vmatprep.mubr.msk.bf16.mxu0 %vm2464_vm1, %v2463_v15 }
 0xc15   :  { %2241 = vmatprep.subr.bf16.mxu0 %v2463_v15 }
 0xc1b   :  { %2232 = vmatmul.mubr.msk.bf16.vlgmr.msra.gmra.mxu0 %vm177_vm2, %v1334_v19 }
 0xc1c   :  { %2242 = vmatpush3.bf16.xpose.msra.mxu0 %v1462_v20  ;;  %2243 = vmatprep.mubr.msk.bf16.mxu0 %vm2464_vm1, %v2463_v15 }
 0xc1d   :  { %2253 = vmatprep.subr.bf16.mxu0 %v2463_v15 }
 0xc23   :  { %2244 = vmatmul.mubr.msk.bf16.vlgmr.msra.gmra.mxu0 %vm177_vm2, %v1455_v21 }
 0xc24   :  { %2257 = vmatprep.mubr.msk.bf16.mxu0 %vm2464_vm1, %v2463_v15 }
 0xccb   :  { %v1135_v22 = vpop.f32.mrf.mxu0 }
 0xccc   :  { %v1136_v23 = vadd.f32 %v1135_v22, %v2648_v53 }
 0xccd   :  { %v2209_v24 = vpop.f32.mrf.mxu0 }
 0xcce   :  { %v1142_v25 = vsel %vm225_vm3, %v1136_v23, -inf }
 0xccf   :  { %1143 = vmax.xlane.f32.xlu1 %v1142_v25  ;;  %v1138_v26 = vpop.f32.mrf.mxu0 }
 0xcd0   :  { %v1139_v27 = vadd.f32 %v1138_v26, %v2654_v57 }
 0xcd1   :  { %v2210_v28 = vpop.f32.mrf.mxu0 }
 0xcd2   :  { %v1145_v29 = vsel %vm225_vm3, %v1139_v27, -inf }
 0xcd3   :  { %1146 = vmax.xlane.f32.xlu0 %v1145_v29  ;;  %v1256_v30 = vpop.f32.mrf.mxu0 }
 0xcd4   :  { %v1257_v33 = vadd.f32 %v1256_v30, %v2648_v53 }
 0xcd5   :  { %v2221_v34 = vpop.f32.mrf.mxu0 }
 0xcd6   :  { %v1263_v31 = vsel %vm225_vm3, %v1257_v33, -inf }
 0xcd7   :  { %1264 = vmax.xlane.f32.xlu0 %v1263_v31  ;;  %v1259_v35 = vpop.f32.mrf.mxu0 }
 0xcd8   :  { %v1260_v36 = vadd.f32 %v1259_v35, %v2654_v57 }
 0xcd9   :  { %v2222_v32 = vpop.f32.mrf.mxu0 }
 0xcda   :  { %v1266_v37 = vsel %vm225_vm3, %v1260_v36, -inf }
 0xcdb   :  { %1267 = vmax.xlane.f32.xlu0 %v1266_v37  ;;  %v1377_v38 = vpop.f32.mrf.mxu0 }
 0xcdc   :  { %v1378_v39 = vadd.f32 %v1377_v38, %v2648_v53 }
 0xcdd   :  { %v2233_v40 = vpop.f32.mrf.mxu0 }
 0xcde   :  { %v1384_v42 = vsel %vm225_vm3, %v1378_v39, -inf }
 0xcdf   :  { %1385 = vmax.xlane.f32.xlu1 %v1384_v42  ;;  %v1380_v43 = vpop.f32.mrf.mxu0 }
 0xce0   :  { %v1381_v44 = vadd.f32 %v1380_v43, %v2654_v57 }
 0xce1   :  { %v2234_v45 = vpop.f32.mrf.mxu0 }
 0xce2   :  { %v1387_v46 = vsel %vm225_vm3, %v1381_v44, -inf }
 0xce3   :  { %1388 = vmax.xlane.f32.xlu0 %v1387_v46  ;;  %v1498_v47 = vpop.f32.mrf.mxu0 }
 0xce4   :  { %v1499_v48 = vadd.f32 %v1498_v47, %v2648_v53 }
 0xce5   :  { %v2245_v49 = vpop.f32.mrf.mxu0 }
 0xce6   :  { %v1505_v50 = vsel %vm225_vm3, %v1499_v48, -inf }
 0xce7   :  { %1506 = vmax.xlane.f32.xlu1 %v1505_v50  ;;  %v1501_v51 = vpop.f32.mrf.mxu0 }
 0xce8   :  { %v1502_v52 = vadd.f32 %v1501_v51, %v2654_v57 }
 0xce9   :  { %v2246_v54 = vpop.f32.mrf.mxu0 }
 0xcea   :  { %v1508_v55 = vsel %vm225_vm3, %v1502_v52, -inf }
 0xceb   :  { %1509 = vmax.xlane.f32.xlu0 %v1508_v55 }
 0xcf8   :  { %1165 = vrot.lane.b32.xlu1 %v2804_v10, %s2472_s1 }
 0xd58   :  { %v1144_v56 = vpop.xlane.xlu1 %1143 }
 0xd59   :  { %v1148_v58 = vsub.f32 %v1136_v23, %v1144_v56 }
 0xd5b   :  { %v1150_v59 = vmul.f32 1.442695, %v1148_v58 }
 0xd5c   :  { %v1147_v60 = vpop.xlane.xlu0 %1146 }
 0xd5d   :  { %2397 = vpow2.f32 %v1150_v59  ;;  %v1149_v53 = vsub.f32 %v1139_v27, %v1147_v60 }
 0xd5f   :  { %v1152_v61 = vmul.f32 1.442695, %v1149_v53 }
 0xd60   :  { %v1265_v62 = vpop.xlane.xlu0 %1264 }
 0xd61   :  { %2399 = vpow2.f32 %v1152_v61  ;;  %v1269_v63 = vsub.f32 %v1257_v33, %v1265_v62 }
 0xd63   :  { %v1271_v2 = vmul.f32 1.442695, %v1269_v63 }
 0xd64   :  { %v1268_v3 = vpop.xlane.xlu0 %1267 }
 0xd65   :  { %2401 = vpow2.f32 %v1271_v2  ;;  %v1270_v57 = vsub.f32 %v1260_v36, %v1268_v3 }
 0xd67   :  { %v1273_v4 = vmul.f32 1.442695, %v1270_v57 }
 0xd68   :  { %v1386_v5 = vpop.xlane.xlu1 %1385 }
 0xd69   :  { %2403 = vpow2.f32 %v1273_v4  ;;  %v1390_v6 = vsub.f32 %v1378_v39, %v1386_v5 }
 0xd6a   :  { %v2398_v7 = vpop.eup %2397 }
 0xd6b   :  { %v1392_v8 = vmul.f32 1.442695, %v1390_v6  ;;  %v1154_v9 = vsel %vm225_vm3, %v2398_v7, 0.0 }
 0xd6c   :  { %v1389_v11 = vpop.xlane.xlu0 %1388  ;;  %1155 = vadd.xlane.f32.xlu1 %v1154_v9 }
 0xd6d   :  { %2405 = vpow2.f32 %v1392_v8  ;;  %v1391_v12 = vsub.f32 %v1381_v44, %v1389_v11 }
 0xd6e   :  { %v2400_v13 = vpop.eup %2399 }
 0xd6f   :  { %v1394_v14 = vmul.f32 1.442695, %v1391_v12  ;;  %v1157_v16 = vsel %vm225_vm3, %v2400_v13, 0.0  ;;  %v2341_v12 = vld [vmem:[%s2976_s6 + $0x18] sm:$0xff]  }
 0xd70   :  { %v1507_v17 = vpop.xlane.xlu1 %1506  ;;  %1158 = vadd.xlane.f32.xlu0 %v1157_v16  ;;  %2254 = vmatpush3.bf16.msra.mxu0 %v2341_v12 }
 0xd71   :  { %2407 = vpow2.f32 %v1394_v14  ;;  %v1511_v41 = vsub.f32 %v1499_v48, %v1507_v17  ;;  %2255 = vmatprep.subr.bf16.mxu0 %v2463_v15 }
 0xd72   :  { %v2402_v18 = vpop.eup %2401 }
 0xd73   :  { %v1513_v19 = vmul.f32 1.442695, %v1511_v41  ;;  %v1275_v20 = vsel %vm225_vm3, %v2402_v18, 0.0  ;;  %v2342_v41 = vld [vmem:[%s2976_s6 + $0x10] sm:$0xff]  }
 0xd74   :  { %1276 = vadd.xlane.f32.xlu1 %v1275_v20  ;;  %v1166_v21 = vpop.permute.xlu1 %1165  ;;  %v1510_v22 = vpop.xlane.xlu0 %1509  ;;  %2256 = vmatpush3.bf16.msra.mxu0 %v2342_v41 }
 0xd75   :  { %2409 = vpow2.f32 %v1513_v19  ;;  %v1512_v23 = vsub.f32 %v1502_v52, %v1510_v22  ;;  %2212 = vmatpush3.bf16.msra.mxu1 %v1166_v21  ;;  %2269 = vmatprep.subr.bf16.mxu0 %v2463_v15 }
 0xd76   :  { %v2404_v24 = vpop.eup %2403  ;;  %2223 = vmatprep.subr.bf16.mxu1 %v2463_v15 }
 0xd77   :  { %v1515_v25 = vmul.f32 1.442695, %v1512_v23  ;;  %v1278_v26 = vsel %vm225_vm3, %v2404_v24, 0.0 }
 0xd78   :  { %1279 = vadd.xlane.f32.xlu0 %v1278_v26 }
 0xd79   :  { %2411 = vpow2.f32 %v1515_v25 }
 0xd7a   :  { %v2406_v27 = vpop.eup %2405 }
 0xd7b   :  { %v1396_v28 = vsel %vm225_vm3, %v2406_v27, 0.0 }
 0xd7c   :  { %1397 = vadd.xlane.f32.xlu1 %v1396_v28 }
 0xd7e   :  { %v2408_v29 = vpop.eup %2407 }
 0xd7f   :  { %v1399_v30 = vsel %vm225_vm3, %v2408_v29, 0.0 }
 0xd80   :  { %1400 = vadd.xlane.f32.xlu0 %v1399_v30 }
 0xd82   :  { %v2410_v33 = vpop.eup %2409 }
 0xd83   :  { %v1517_v34 = vsel %vm225_vm3, %v2410_v33, 0.0 }
 0xd84   :  { %1518 = vadd.xlane.f32.xlu1 %v1517_v34 }
 0xd86   :  { %v2412_v31 = vpop.eup %2411 }
 0xd87   :  { %v1520_v35 = vsel %vm225_vm3, %v2412_v31, 0.0 }
 0xd88   :  { %1521 = vadd.xlane.f32.xlu0 %v1520_v35 }
 0xd95   :  { %1407 = vrot.lane.b32.xlu1 %v2804_v10, %s2473_s30 }
 0xd99   :  { %1528 = vrot.lane.b32.xlu1 %v2804_v10, %s2474_s0 }
 0xd9e   :  { %1286 = vrot.lane.b32.xlu0 %v2804_v10, %s2995_s5 }
 0xdf5   :  { %v1156_v36 = vpop.xlane.xlu1 %1155 }
 0xdf6   :  { %2413 = vrcp.f32 %v1156_v36 }
 0xdf9   :  { %v1159_v32 = vpop.xlane.xlu0 %1158 }
 0xdfa   :  { %2415 = vrcp.f32 %v1159_v32 }
 0xdfd   :  { %v1277_v38 = vpop.xlane.xlu1 %1276 }
 0xe01   :  { %v1280_v37 = vpop.xlane.xlu0 %1279 }
 0xe02   :  { %2417 = vrcp.f32 %v1280_v37 }
 0xe03   :  { %v2414_v39 = vpop.eup %2413  ;;  %2419 = vrcp.f32 %v1277_v38 }
 0xe04   :  { %v1162_v42 = vmul.f32 %v2414_v39, %v2398_v7 }
 0xe05   :  { %v1398_v45 = vpop.xlane.xlu1 %1397 }
 0xe07   :  { %v2416_v40 = vpop.eup %2415 }
 0xe08   :  { %v1163_v43 = vmul.f32 %v2416_v40, %v2400_v13 }
 0xe09   :  { %v1401_v44 = vpop.xlane.xlu0 %1400 }
 0xe0a   :  { %v1164_v46 = vpack.c.bf16 %v1163_v43, %v1162_v42  ;;  %2421 = vrcp.f32 %v1401_v44  ;;  %v2017_v43 = vld [vmem:[%s2977_s7 + $0x1] ss:$0 sm:$0xff] }
 0xe0b   :  { %2423 = vrcp.f32 %v1398_v45 }
 0xe0c   :  { %2214 = vmatmul.mubr.msk.bf16.vlgmr.msra.gmra.mxu1 %vm225_vm3, %v1164_v46 }
 0xe0d   :  { %2225 = vmatprep.mubr.msk.bf16.mxu1 %vm2464_vm1, %v2463_v15  ;;  %v1519_v49 = vpop.xlane.xlu1 %1518 }
 0xe0f   :  { %v2418_v10 = vpop.eup %2417 }
 0xe10   :  { %v2420_v48 = vpop.eup %2419  ;;  %v1284_v50 = vmul.f32 %v2418_v10, %v2404_v24 }
 0xe11   :  { %v1522_v47 = vpop.xlane.xlu0 %1521  ;;  %v1283_v52 = vmul.f32 %v2420_v48, %v2402_v18  ;;  %v1408_v56 = vpop.permute.xlu1 %1407 }
 0xe12   :  { %2425 = vrcp.f32 %v1522_v47 }
 0xe13   :  { %2427 = vrcp.f32 %v1519_v49  ;;  %v1285_v54 = vpack.c.bf16 %v1284_v50, %v1283_v52 }
 0xe15   :  { %v1287_v51 = vpop.permute.xlu0 %1286  ;;  %v1529_v62 = vpop.permute.xlu1 %1528 }
 0xe16   :  { %2224 = vmatpush3.bf16.msra.mxu1 %v1287_v51 }
 0xe17   :  { %2235 = vmatprep.subr.bf16.mxu1 %v2463_v15  ;;  %v2422_v55 = vpop.eup %2421 }
 0xe18   :  { %v2424_v58 = vpop.eup %2423  ;;  %v1405_v59 = vmul.f32 %v2422_v55, %v2408_v29 }
 0xe19   :  { %2226 = vmatmul.mubr.msk.bf16.vlgmr.msra.gmra.mxu1 %vm225_vm3, %v1285_v54  ;;  %v1404_v60 = vmul.f32 %v2424_v58, %v2406_v27 }
 0xe1a   :  { %2236 = vmatpush3.bf16.msra.mxu1 %v1408_v56  ;;  %2237 = vmatprep.mubr.msk.bf16.mxu1 %vm2464_vm1, %v2463_v15 }
 0xe1b   :  { %2247 = vmatprep.subr.bf16.mxu1 %v2463_v15  ;;  %v1406_v53 = vpack.c.bf16 %v1405_v59, %v1404_v60 }
 0xe1f   :  { %v2426_v61 = vpop.eup %2425 }
 0xe20   :  { %v2428_v63 = vpop.eup %2427  ;;  %v1526_v2 = vmul.f32 %v2426_v61, %v2412_v31 }
 0xe21   :  { %2238 = vmatmul.mubr.msk.bf16.vlgmr.msra.gmra.mxu1 %vm225_vm3, %v1406_v53  ;;  %v1525_v3 = vmul.f32 %v2428_v63, %v2410_v33  ;;  %v2344_v63 = vld [vmem:[%s2980_s10 + $0x10] sm:$0xff]  }
 0xe22   :  { %2248 = vmatpush3.bf16.msra.mxu1 %v1529_v62  ;;  %2249 = vmatprep.mubr.msk.bf16.mxu1 %vm2464_vm1, %v2463_v15 }
 0xe23   :  { %2261 = vmatprep.subr.bf16.mxu1 %v2463_v15  ;;  %v1527_v57 = vpack.c.bf16 %v1526_v2, %v1525_v3 }
 0xe29   :  { %2250 = vmatmul.mubr.msk.bf16.vlgmr.msra.gmra.mxu1 %vm225_vm3, %v1527_v57 }
 0xe2a   :  { %2265 = vmatprep.mubr.msk.bf16.mxu1 %vm2464_vm1, %v2463_v15 }
 0xecc   :  { %v1205_v4 = vpop.f32.mrf.mxu1 }
 0xece   :  { %v2215_v5 = vpop.f32.mrf.mxu1 }
 0xed0   :  { %v1208_v6 = vpop.f32.mrf.mxu1 }
 0xed2   :  { %v2216_v7 = vpop.f32.mrf.mxu1 }
 0xed9   :  { %v1326_v8 = vpop.f32.mrf.mxu1 }
 0xedb   :  { %v2227_v9 = vpop.f32.mrf.mxu1 }
 0xedc   :  { %v2023_v9 = vld [vmem:[%s2978_s8 + $0x1] ss:$0 sm:$0xff] }
 0xedd   :  { %v1329_v11 = vpop.f32.mrf.mxu1 }
 0xede   :  { %v2314_v13 = vpack.i.bf16 %v1329_v11, %v1326_v8 }
 0xedf   :  { %v2228_v14 = vpop.f32.mrf.mxu1 }
 0xee0   :  { %2315 = vrot.lane.b32.xlu1 %v2314_v13, %s2996_s21  ;;  %v2024_v14 = vld [vmem:[%s2979_s9 + $0x1] ss:$0 sm:$0xff] }
 0xee1   :  { %v1447_v16 = vpop.f32.mrf.mxu1 }
 0xee3   :  { %v2239_v17 = vpop.f32.mrf.mxu1 }
 0xee5   :  { %v1450_v18 = vpop.f32.mrf.mxu1 }
 0xee6   :  { %v2319_v19 = vpack.i.bf16 %v1450_v18, %v1447_v16 }
 0xee7   :  { %v2240_v20 = vpop.f32.mrf.mxu1 }
 0xee8   :  { %2320 = vrot.lane.b32.xlu0 %v2319_v19, %s2997_s24  ;;  %v2345_v19 = vld [vmem:[%s2982_s12 + $0x38] sm:$0xff]   ;;  %v2346_v20 = vld [vmem:[%s2982_s12 + $0x30] sm:$0xff]  }
 0xee9   :  { %v1568_v21 = vpop.f32.mrf.mxu1 }
 0xeeb   :  { %v2251_v22 = vpop.f32.mrf.mxu1 }
 0xeec   :  { %v2348_v22 = vld [vmem:[%s2982_s12 + $0x20] sm:$0xff]  }
 0xeed   :  { %v1571_v23 = vpop.f32.mrf.mxu1 }
 0xeee   :  { %v2324_v24 = vpack.i.bf16 %v1571_v23, %v1568_v21  ;;  %v2347_v21 = vld [vmem:[%s2982_s12 + $0x28] sm:$0xff]   ;;  %v2030_v23 = vld [vmem:[%s2981_s11 + $0x1] ss:$0 sm:$0xff] }
 0xeef   :  { %v2252_v25 = vpop.f32.mrf.mxu1 }
 0xef0   :  { %2325 = vrot.lane.b32.xlu1 %v2324_v24, %s2998_s25  ;;  %s2479_s25 = smov [#allocation2]  }
 0xef1   :  { %s1952_s6 = sshll.u32 %s2479_s25, 4  ;;  %s1953_s6 = int_to_ptr.vmem [resolvable:$true] %s1952_s6 }
 0xef2   :  { %s2441_s1 = scalar_lea.vmem %s1953_s6, 256  ;;  %p2446_p1 = scmp.lt.s32.totalorder %s1953_s6, %s1953_s6 }
 0xef3   :  { %p2442_p0 = scmp.ne.s32.totalorder %s1953_s6, %s2441_s1  ;;  %p2447_p2 = scmp.lt.s32.totalorder %s2441_s1, %s2441_s1 }
 0xef5   :  { %p2448_p3 = por %p2447_p2, %p2446_p1 }
 0xef7   :  { %p2449_p4 = pnand %p2448_p3, %p2442_p0 }
 0xf52   :  { %v2316_v26 = vpop.permute.xlu1 %2315 }
 0xf53   :  { %v2318_v28 = vunpack.i.h.bf16 %v2316_v26  ;;  %v2317_v29 = vunpack.i.l.bf16 %v2316_v26 }
 0xf55   :  { %v1600_v31 = vsel %vm177_vm2, %v1208_v6, %v2318_v28  ;;  %v1599_v35 = vsel %vm177_vm2, %v1205_v4, %v2317_v29 }
 0xf5a   :  { %v2321_v27 = vpop.permute.xlu0 %2320 }
 0xf5b   :  { %v2323_v30 = vunpack.i.h.bf16 %v2321_v27  ;;  %v2322_v33 = vunpack.i.l.bf16 %v2321_v27 }
 0xf5d   :  { %v1602_v37 = vsel %vm225_vm3, %v1600_v31, %v2323_v30  ;;  %v1601_v38 = vsel %vm225_vm3, %v1599_v35, %v2322_v33 }
 0xf62   :  { %v2326_v34 = vpop.permute.xlu1 %2325 }
 0xf63   :  { %v2328_v36 = vunpack.i.h.bf16 %v2326_v34  ;;  %v2327_v32 = vunpack.i.l.bf16 %v2326_v34 }
 0xf65   :  { %v1604_v39 = vsel %vm687_vm4, %v1602_v37, %v2328_v36  ;;  %v1603_v40 = vsel %vm687_vm4, %v1601_v38, %v2327_v32 }
 0xf66   :  { %v1605_v42 = vpack.c.bf16 %v1604_v39, %v1603_v40 }
 0xf68   :  { %2258 = vmatmul.mubr.msk.bf16.vlgmr.msra.gmra.mxu0 %vm61_vm0, %v1605_v42 }
 0xf69   :  { %2277 = vmatprep.mubr.msk.bf16.mxu0 %vm2464_vm1, %v2463_v15  ;;  %2270 = vmatpush3.bf16.msra.mxu0 %v2345_v19 }
 0xf6a   :  { %2271 = vmatprep.subr.bf16.mxu0 %v2463_v15 }
 0xf6d   :  { %2272 = vmatpush3.bf16.msra.mxu0 %v2346_v20 }
 0xf6e   :  { %2273 = vmatprep.subr.bf16.mxu0 %v2463_v15 }
 0xf71   :  { %2274 = vmatpush3.bf16.msra.mxu0 %v2347_v21 }
 0xf72   :  { %2275 = vmatprep.subr.bf16.mxu0 %v2463_v15 }
 0xf75   :  { %2276 = vmatpush3.bf16.msra.mxu0 %v2348_v22 }
0x1028   :  { %v1668_v44 = vpop.f32.mrf.mxu0 }
0x1029   :  { %v1669_v45 = vadd.f32 %v2017_v43, %v1668_v44 }
0x102a   :  { %v2259_v46 = vpop.f32.mrf.mxu0 }
0x102b   :  { %v1675_v10 = vadd.f32 %v1669_v45, %v2792_v0 }
0x102c   :  { %v1671_v47 = vpop.f32.mrf.mxu0 }
0x102d   :  { %v1672_v48 = vadd.f32 %v2017_v43, %v1671_v47  ;;  %v1681_v49 = vsel %vm61_vm0, %v1675_v10, 0.0 }
0x102e   :  { %1682 = vadd.xlane.f32.xlu0 %v1681_v49  ;;  %v2260_v50 = vpop.f32.mrf.mxu0 }
0x102f   :  { %v1676_v51 = vadd.f32 %v1672_v48, %v2794_v1  ;;  %v2343_v1 = vld [vmem:[%s2980_s10 + $0x18] sm:$0xff]   ;;  %v2043_v48 = vld [vmem:[%s2983_s13 + $0x1] ss:$0 sm:$0xff] }
0x1030   :  { %2262 = vmatpush3.bf16.msra.mxu1 %v2343_v1 }
0x1031   :  { %v1684_v52 = vsel %vm61_vm0, %v1676_v51, 0.0  ;;  %2263 = vmatprep.subr.bf16.mxu1 %v2463_v15 }
0x1032   :  { %1685 = vadd.xlane.f32.xlu1 %v1684_v52 }
0x1034   :  { %2264 = vmatpush3.bf16.msra.mxu1 %v2344_v63 }
0x10b7   :  { %v1683_v54 = vpop.xlane.xlu0 %1682 }
0x10b8   :  { %v1687_v55 = vmul.f32 0.03125, %v1683_v54 }
0x10ba   :  { %v1689_v56 = vsub.f32 %v1675_v10, %v1687_v55 }
0x10bb   :  { %v1686_v58 = vpop.xlane.xlu1 %1685 }
0x10bc   :  { %v1688_v59 = vmul.f32 0.03125, %v1686_v58  ;;  %v1691_v60 = vmul.f32 %v1689_v56, %v1689_v56 }
0x10be   :  { %v1690_v53 = vsub.f32 %v1676_v51, %v1688_v59  ;;  %v1693_v0 = vsel %vm61_vm0, %v1691_v60, 0.0 }
0x10bf   :  { %1694 = vadd.xlane.f32.xlu0 %v1693_v0 }
0x10c0   :  { %v1692_v61 = vmul.f32 %v1690_v53, %v1690_v53 }
0x10c2   :  { %v1696_v62 = vsel %vm61_vm0, %v1692_v61, 0.0 }
0x10c3   :  { %1697 = vadd.xlane.f32.xlu0 %v1696_v62 }
0x1148   :  { %v1695_v2 = vpop.xlane.xlu0 %1694 }
0x1149   :  { %v1699_v3 = vmul.f32 0.03125, %v1695_v2 }
0x114b   :  { %v1701_v57 = vadd.f32 1e-12, %v1699_v3 }
0x114c   :  { %v1698_v4 = vpop.xlane.xlu0 %1697 }
0x114d   :  { %2429 = vrsqrt.f32 %v1701_v57  ;;  %v1700_v5 = vmul.f32 0.03125, %v1698_v4 }
0x114f   :  { %v1702_v6 = vadd.f32 1e-12, %v1700_v5 }
0x1151   :  { %2431 = vrsqrt.f32 %v1702_v6 }
0x115a   :  { %v2430_v7 = vpop.eup %2429 }
0x115b   :  { %v1705_v8 = vmul.f32 %v2430_v7, %v1689_v56 }
0x115d   :  { %v1713_v13 = vmul.f32 %v2023_v9, %v1705_v8 }
0x115e   :  { %v2432_v11 = vpop.eup %2431 }
0x115f   :  { %v1706_v12 = vmul.f32 %v2432_v11, %v1690_v53  ;;  %v1721_v17 = vadd.f32 %v2024_v14, %v1713_v13  ;;  %v2051_v13 = vld [vmem:[%s2984_s14 + $0x1] ss:$0 sm:$0xff] }
0x1161   :  { %v1714_v16 = vmul.f32 %v2023_v9, %v1706_v12 }
0x1163   :  { %v1722_v41 = vadd.f32 %v2024_v14, %v1714_v16  ;;  %v2052_v16 = vld [vmem:[%s2985_s15 + $0x1] ss:$0 sm:$0xff] }
0x1165   :  { %v1723_v18 = vpack.c.bf16 %v1722_v41, %v1721_v17 }
0x1167   :  { %2266 = vmatmul.mubr.msk.bf16.vlgmr.msra.gmra.mxu1 %vm61_vm0, %v1723_v18 }
0x1227   :  { %v1786_v24 = vpop.f32.mrf.mxu1 }
0x1228   :  { %v1787_v25 = vadd.f32 %v2030_v23, %v1786_v24 }
0x1229   :  { %v2267_v26 = vpop.f32.mrf.mxu1 }
0x122a   :  { %v1795_v27 = vmul.f32 0.044715, %v1787_v25  ;;  %v1793_v43 = vmul.f32 0.5, %v1787_v25 }
0x122b   :  { %v1789_v28 = vpop.f32.mrf.mxu1 }
0x122c   :  { %v1797_v29 = vmul.f32 %v1795_v27, %v1787_v25  ;;  %v1790_v30 = vadd.f32 %v2030_v23, %v1789_v28 }
0x122d   :  { %v2268_v33 = vpop.f32.mrf.mxu1 }
0x122e   :  { %v1799_v34 = vmul.f32 %v1797_v29, %v1787_v25  ;;  %v1796_v31 = vmul.f32 0.044715, %v1790_v30  ;;  %v1794_v44 = vmul.f32 0.5, %v1790_v30 }
0x1230   :  { %v1801_v35 = vadd.f32 %v1799_v34, %v1787_v25  ;;  %v1798_v36 = vmul.f32 %v1796_v31, %v1790_v30 }
0x1232   :  { %v1803_v32 = vmul.f32 0.7978846, %v1801_v35  ;;  %v1800_v37 = vmul.f32 %v1798_v36, %v1790_v30 }
0x1234   :  { %2433 = vtanh.f32 %v1803_v32  ;;  %v1802_v15 = vadd.f32 %v1800_v37, %v1790_v30 }
0x1236   :  { %v1804_v38 = vmul.f32 0.7978846, %v1802_v15 }
0x1238   :  { %2435 = vtanh.f32 %v1804_v38 }
0x1241   :  { %v2434_v39 = vpop.eup %2433 }
0x1242   :  { %v1807_v40 = vadd.f32 1.0, %v2434_v39 }
0x1244   :  { %v1809_v46 = vmul.f32 %v1807_v40, %v1793_v43 }
0x1245   :  { %v2436_v42 = vpop.eup %2435 }
0x1246   :  { %v1808_v45 = vadd.f32 1.0, %v2436_v42 }
0x1248   :  { %v1810_v10 = vmul.f32 %v1808_v45, %v1794_v44 }
0x124a   :  { %v1811_v47 = vpack.c.bf16 %v1810_v10, %v1809_v46 }
0x124c   :  { %2278 = vmatmul.mubr.msk.bf16.vlgmr.msra.gmra.mxu0 %vm930_vm5, %v1811_v47 }
0x130c   :  { %v1890_v49 = vpop.f32.mrf.mxu0 }
0x130d   :  { %v1891_v50 = vadd.f32 %v2043_v48, %v1890_v49 }
0x130e   :  { %v2279_v51 = vpop.f32.mrf.mxu0 }
0x130f   :  { %v1897_v52 = vadd.f32 %v1891_v50, %v1721_v17 }
0x1310   :  { %v1893_v54 = vpop.f32.mrf.mxu0 }
0x1311   :  { %v1894_v55 = vadd.f32 %v2043_v48, %v1893_v54  ;;  %v1903_v56 = vsel %vm61_vm0, %v1897_v52, 0.0 }
0x1312   :  { %1904 = vadd.xlane.f32.xlu0 %v1903_v56  ;;  %v2280_v58 = vpop.f32.mrf.mxu0 }
0x1313   :  { %v1898_v59 = vadd.f32 %v1894_v55, %v1722_v41 }
0x1315   :  { %v1906_v60 = vsel %vm61_vm0, %v1898_v59, 0.0 }
0x1316   :  { %1907 = vadd.xlane.f32.xlu1 %v1906_v60 }
0x139b   :  { %v1905_v53 = vpop.xlane.xlu0 %1904 }
0x139c   :  { %v1909_v0 = vmul.f32 0.03125, %v1905_v53 }
0x139e   :  { %v1911_v61 = vsub.f32 %v1897_v52, %v1909_v0 }
0x139f   :  { %v1908_v62 = vpop.xlane.xlu1 %1907 }
0x13a0   :  { %v1910_v1 = vmul.f32 0.03125, %v1908_v62  ;;  %v1913_v63 = vmul.f32 %v1911_v61, %v1911_v61 }
0x13a2   :  { %v1912_v2 = vsub.f32 %v1898_v59, %v1910_v1  ;;  %v1915_v3 = vsel %vm61_vm0, %v1913_v63, 0.0 }
0x13a3   :  { %1916 = vadd.xlane.f32.xlu0 %v1915_v3 }
0x13a4   :  { %v1914_v57 = vmul.f32 %v1912_v2, %v1912_v2 }
0x13a6   :  { %v1918_v4 = vsel %vm61_vm0, %v1914_v57, 0.0 }
0x13a7   :  { %1919 = vadd.xlane.f32.xlu1 %v1918_v4 }
0x142c   :  { %v1917_v5 = vpop.xlane.xlu0 %1916 }
0x142d   :  { %v1921_v6 = vmul.f32 0.03125, %v1917_v5 }
0x142f   :  { %v1923_v7 = vadd.f32 1e-12, %v1921_v6 }
0x1430   :  { %v1920_v8 = vpop.xlane.xlu1 %1919 }
0x1431   :  { %2437 = vrsqrt.f32 %v1923_v7  ;;  %v1922_v9 = vmul.f32 0.03125, %v1920_v8 }
0x1433   :  { %v1924_v11 = vadd.f32 1e-12, %v1922_v9 }
0x1435   :  { %2439 = vrsqrt.f32 %v1924_v11 }
0x143e   :  { %v2438_v12 = vpop.eup %2437 }
0x143f   :  { %v1927_v14 = vmul.f32 %v2438_v12, %v1911_v61 }
0x1441   :  { %v1935_v17 = vmul.f32 %v2051_v13, %v1927_v14 }
0x1442   :  { %v2440_v41 = vpop.eup %2439 }
0x1443   :  { %v1928_v18 = vmul.f32 %v2440_v41, %v1912_v2  ;;  %v1943_v19 = vadd.f32 %v2052_v16, %v1935_v17 }
0x1445   :  { %v1936_v20 = vmul.f32 %v2051_v13, %v1928_v18  ;;  %1945 = vst.msk [vmem:[#allocation2] sm:$0xff] %vm61_vm0, %v1943_v19 }
0x1447   :  { %v1944_v21 = vadd.f32 %v2052_v16, %v1936_v20 }
0x1449   :  { %1946 = vst.msk [vmem:[#allocation2 + $0x8] sm:$0xff] %vm61_vm0, %v1944_v21 }
0x144a   :  { %2452 = shalt.err (!%p2449_p4)
}
0x144b   :  { %s2480_s14 = smov 128  }
0x144c   :  { %1958 = dma.vmem_to_hbm [thread:$0]  %s1953_s6, 256, %s2986_s16, [#allocation3], %s2480_s14, %s2480_s14, %s2996_s21  }
0x144d   :  { %2461 = dma.done.wait [#allocation3], 256  }
0x144e   :  { %2462 = vsyncadd [#allocation3], 4294967040 }
0x144f   :  { %1962 = vsyncpa [#allocation3], 1 }

</bundles_post_ra>
